<compile_context>
chip_gen: v7x
topology: tpu7x:2x2x1
jax: 0.10.0
libtpu: 0.0.40
codegen_flags: <defaults>
</compile_context>

<pallas_src>
import jax
import jax.numpy as jnp
from jax import lax
from jax.experimental import pallas as pl
from jax.experimental.pallas import tpu as pltpu

D_MODEL = 128
N_HEAD = 16
HEAD_DIM = D_MODEL // N_HEAD          # 8
D_FF = 768
N_LAYERS = 6
EPS = 1e-5                            # nn.LayerNorm default
NEG_SLOPE = 0.01                      # nn.LeakyReLU default


def _layer_norm(v, w, b):
    mu = jnp.mean(v, axis=-1, keepdims=True)
    var = jnp.mean(jnp.square(v - mu), axis=-1, keepdims=True)
    return (v - mu) * lax.rsqrt(var + EPS) * w + b


def _leaky_relu(v):
    return jnp.where(v > 0, v, NEG_SLOPE * v)


def _mm(a, w):
    # bf16 MXU matmul, f32 accumulation; `w` already bf16 in [in, out] layout.
    return jnp.dot(a.astype(jnp.bfloat16), w, preferred_element_type=jnp.float32)


def outfit_transformer_kernel(
    x_ref, mask_ref, hm_ref,
    wqkv_ref, bqkv_ref, wout_ref, bout_ref,
    w1_ref, b1_ref, w2_ref, b2_ref,
    n1w_ref, n1b_ref, n2w_ref, n2b_ref,
    fnw_ref, fnb_ref,
    c1w_ref, c1b_ref, c2w_ref, c2b_ref,
    o_ref,
    x_state,
):
    TB, S1p, D = x_ref.shape
    HS = N_HEAD * S1p                  # head-major expanded key/value axis
    R = TB * S1p                       # flattened MXU rows
    l = pl.program_id(1)               # layer index (inner, "arbitrary" grid axis)

    # First layer of each batch block: load the CLS-prepended, padded activations.
    @pl.when(l == 0)
    def _():
        x_state[...] = x_ref[...].reshape(R, D)

    x = x_state[...]                   # [R, D] f32 residual stream
    mask_add = mask_ref[...]           # [TB, 1, HS] additive key mask (0 / -1e9)
    hm = hm_ref[...]                   # [HS, D] bf16: hm[c,l]=1 iff lane l in head c//S1p

    # ---- multi-head self-attention (post-norm); 1/sqrt(hd) folded into q proj ----
    qkv = _mm(x, wqkv_ref[0]) + bqkv_ref[0]                       # [R, 3D] f32
    q3 = qkv[:, 0:D].reshape(TB, S1p, D).astype(jnp.bfloat16)
    k3 = qkv[:, D:2 * D].reshape(TB, S1p, D).astype(jnp.bfloat16)
    v3 = qkv[:, 2 * D:3 * D].reshape(TB, S1p, D).astype(jnp.bfloat16)

    # Head-major expansion: row c = h*S1p + j keeps only head h's 8 lanes.
    # (bf16 elementwise; on v5e this runs via f32 converts — accepted.)
    k_exp = jnp.broadcast_to(k3[:, None, :, :],
                             (TB, N_HEAD, S1p, D)).reshape(TB, HS, D) * hm
    v_exp = jnp.broadcast_to(v3[:, None, :, :],
                             (TB, N_HEAD, S1p, D)).reshape(TB, HS, D) * hm
    # Fused denominator: extra 128 lanes of hm make lanes D:2D of the value matmul
    # output equal the per-head softmax sums (free widening on the 256-wide MXU).
    v_aug = jnp.concatenate(
        [v_exp, jnp.broadcast_to(hm, (TB, HS, D))], axis=-1)      # [TB, HS, 2D] bf16

    # Per-head scores via masked 128-lane contraction (canonical NT flash pattern).
    s = jnp.einsum('bil,bcl->bic', q3, k_exp,
                   preferred_element_type=jnp.float32) + mask_add  # [TB, S1p, HS]
    # Single cross-head row max as the exp shift (safe unless a head's max is ~80+
    # below the global max; then that head underflows and collapses to ~0 via clamp).
    m = jnp.max(s, axis=-1, keepdims=True)
    e = jnp.exp(s - m).astype(jnp.bfloat16)                        # softmax numerators
    ov = jnp.einsum('bic,bcl->bil', e, v_aug,
                    preferred_element_type=jnp.float32)            # [TB, S1p, 2D] f32
    den = jnp.maximum(ov[..., D:], 1e-30)
    attn = (ov[..., :D] * pl.reciprocal(den, approx=True)).reshape(R, D)

    attn = _mm(attn, wout_ref[0]) + bout_ref[0]
    x = _layer_norm(x + attn, n1w_ref[0], n1b_ref[0])

    # ---- feed-forward (relu) ----
    h = jnp.maximum(_mm(x, w1_ref[0]) + b1_ref[0], 0.0)
    ffn = _mm(h, w2_ref[0]) + b2_ref[0]
    x = _layer_norm(x + ffn, n2w_ref[0], n2b_ref[0])
    x_state[...] = x

    # ---- after the last layer: final encoder norm + classifier on the CLS token ----
    @pl.when(l == N_LAYERS - 1)
    def _():
        xf = _layer_norm(x, fnw_ref[...], fnb_ref[...])
        cls = xf.reshape(TB, S1p, D)[:, 0, :]                      # [TB, D]
        y = _leaky_relu(cls)
        y = _mm(y, c1w_ref[...]) + c1b_ref[...]
        y = _leaky_relu(y)
        y = _mm(y, c2w_ref[...]) + c2b_ref[...]                    # [TB, 1]
        y = 1.0 / (1.0 + jnp.exp(-y))                              # exact sigmoid
        # lane-dense unmasked store; wrapper reads column 0
        o_ref[...] = jnp.broadcast_to(y[:, :, None], (TB, 1, D))


def init_params(key):
    ks = jax.random.split(key, 16)
    L, D, F = N_LAYERS, D_MODEL, D_FF

    def xav(k, shape):
        fan_out, fan_in = shape[-2], shape[-1]
        bound = (6.0 / (fan_in + fan_out)) ** 0.5
        return jax.random.uniform(k, shape, jnp.float32, -bound, bound)

    def unif(k, shape, b=0.05):
        return jax.random.uniform(k, shape, jnp.float32, -b, b)

    return dict(
        inw=xav(ks[0], (L, 3 * D, D)),   inb=unif(ks[1], (L, 1, 3 * D)),
        outw=xav(ks[2], (L, D, D)),      outb=unif(ks[3], (L, 1, D)),
        l1w=xav(ks[4], (L, F, D)),       l1b=unif(ks[5], (L, 1, F)),
        l2w=xav(ks[6], (L, D, F)),       l2b=unif(ks[7], (L, 1, D)),
        n1w=jnp.ones((L, 1, D), jnp.float32), n1b=jnp.zeros((L, 1, D), jnp.float32),
        n2w=jnp.ones((L, 1, D), jnp.float32), n2b=jnp.zeros((L, 1, D), jnp.float32),
        fnw=jnp.ones((1, D), jnp.float32),    fnb=jnp.zeros((1, D), jnp.float32),
        c1w=xav(ks[8], (D, D)),          c1b=unif(ks[9], (1, D)),
        c2w=xav(ks[10], (1, D)),         c2b=unif(ks[11], (1, 1)),
        type_emb=jax.random.uniform(ks[12], (2, D), jnp.float32, -0.1, 0.1),
    )


def outfit_transformer_cp(params, x, attention_mask):
    """task == 'cp' forward. x: [B, S, 128] f32, attention_mask: [B, S] bool (True = pad)."""
    B, S, D = x.shape
    assert D == D_MODEL
    L, F = N_LAYERS, D_FF
    S1 = S + 1
    S1p = ((S1 + 7) // 8) * 8                 # pad seq (incl. CLS) to a sublane multiple
    HS = N_HEAD * S1p
    scale = 1.0 / (HEAD_DIM ** 0.5)

    # Batch packing: ~512 MXU rows per grid step (half-depth K=128 contraction on the
    # 256-wide v6e/v7x MXU), but keep >=2 grid steps so the "parallel" batch axis can
    # span both v7x TensorCores.
    tb_target = max(1, 512 // S1p)
    n_steps = -(-B // tb_target)
    if B >= 2:
        n_steps = max(n_steps, 2)
    TB = -(-B // n_steps)
    B_pad = n_steps * TB

    # glue: prepend compatibility-token embedding, pad sequence + batch
    comp = jnp.broadcast_to(params["type_emb"][0][None, None, :], (B, 1, D))
    xf = jnp.concatenate([comp, x.astype(jnp.float32)], axis=1)            # [B, S1, D]
    xf = jnp.pad(xf, ((0, B_pad - B), (0, S1p - S1), (0, 0)))

    token_mask = jnp.zeros((B, 1), dtype=bool)
    full_mask = jnp.concatenate([token_mask, attention_mask.astype(bool)], axis=1)
    full_mask = jnp.pad(full_mask, ((0, B_pad - B), (0, S1p - S1)),
                        constant_values=True)                              # pads = masked keys
    add_mask = jnp.where(full_mask, -1e9, 0.0).astype(jnp.float32)         # [B_pad, S1p]
    mask_exp = jnp.tile(add_mask, (1, N_HEAD)).reshape(B_pad, 1, HS)       # head-major

    # precomputed head-lane mask: hm[c, l] = 1 iff lane l belongs to head c // S1p
    hm = ((jnp.arange(HS)[:, None] // S1p) ==
          (jnp.arange(D)[None, :] // HEAD_DIM)).astype(jnp.bfloat16)

    # weights: pre-transpose to [in, out], bf16 matmul operands; fold 1/sqrt(hd) into q proj
    bf = jnp.bfloat16
    wqkv_f = jnp.transpose(params["inw"], (0, 2, 1))                       # [L, D, 3D]
    wqkv = wqkv_f.at[:, :, :D].multiply(scale).astype(bf)
    bqkv = params["inb"].at[:, :, :D].multiply(scale)                      # f32 bias
    wout = jnp.transpose(params["outw"], (0, 2, 1)).astype(bf)             # [L, D, D]
    w1 = jnp.transpose(params["l1w"], (0, 2, 1)).astype(bf)                # [L, D, F]
    w2 = jnp.transpose(params["l2w"], (0, 2, 1)).astype(bf)                # [L, F, D]
    c1w = params["c1w"].T.astype(bf)                                       # [D, D]
    c2w = params["c2w"].T.astype(bf)                                       # [D, 1]

    blk = lambda b, l: (b, 0, 0)     # per-batch block, layer-invariant (fetched once/block)
    lyr = lambda b, l: (l, 0, 0)     # layer-streamed weights (prefetched during layer l-1)
    cst2 = lambda b, l: (0, 0)

    in_specs = [
        pl.BlockSpec((TB, S1p, D), blk),             # x (padded, with CLS token)
        pl.BlockSpec((TB, 1, HS), blk),              # expanded additive key mask
        pl.BlockSpec((HS, D), cst2),                 # head-lane mask (bf16)
        pl.BlockSpec((1, D, 3 * D), lyr),            # qkv weight (bf16, [in, out])
        pl.BlockSpec((1, 1, 3 * D), lyr),            # qkv bias
        pl.BlockSpec((1, D, D), lyr),                # out_proj weight
        pl.BlockSpec((1, 1, D), lyr),                # out_proj bias
        pl.BlockSpec((1, D, F), lyr),                # linear1 weight
        pl.BlockSpec((1, 1, F), lyr),                # linear1 bias
        pl.BlockSpec((1, F, D), lyr),                # linear2 weight
        pl.BlockSpec((1, 1, D), lyr),                # linear2 bias
        pl.BlockSpec((1, 1, D), lyr),                # norm1 weight
        pl.BlockSpec((1, 1, D), lyr),                # norm1 bias
        pl.BlockSpec((1, 1, D), lyr),                # norm2 weight
        pl.BlockSpec((1, 1, D), lyr),                # norm2 bias
        pl.BlockSpec((1, D), cst2),                  # final encoder norm weight
        pl.BlockSpec((1, D), cst2),                  # final encoder norm bias
        pl.BlockSpec((D, D), cst2),                  # classifier linear1 weight
        pl.BlockSpec((1, D), cst2),                  # classifier linear1 bias
        pl.BlockSpec((D, 1), cst2),                  # classifier linear2 weight
        pl.BlockSpec((1, 1), cst2),                  # classifier linear2 bias
    ]

    out = pl.pallas_call(
        outfit_transformer_kernel,
        grid=(n_steps, N_LAYERS),                    # batch blocks x layers
        in_specs=in_specs,
        out_specs=pl.BlockSpec((TB, 1, D), blk),     # lane-dense, written at last layer
        out_shape=jax.ShapeDtypeStruct((B_pad, 1, D), jnp.float32),
        scratch_shapes=[pltpu.VMEM((TB * S1p, D), jnp.float32)],   # residual stream
        compiler_params=pltpu.CompilerParams(
            dimension_semantics=("parallel", "arbitrary"),   # batch // 2 TCs on v7x; layers sequential
            vmem_limit_bytes=32 * 1024 * 1024,               # right-sized (v7x 64 MiB/TC safe)
        ),
    )(
        xf, mask_exp, hm,
        wqkv, bqkv, wout, params["outb"],
        w1, params["l1b"], w2, params["l2b"],
        params["n1w"], params["n1b"], params["n2w"], params["n2b"],
        params["fnw"], params["fnb"],
        c1w, params["c1b"], c2w, params["c2b"],
    )
    return out[:B, 0, :1]                            # [B, 1] sigmoid compatibility score


if __name__ == "__main__":
    key = jax.random.PRNGKey(0)
    pkey, xkey = jax.random.split(key)
    params = init_params(pkey)

    B, S = 2, 8
    x = jax.random.normal(xkey, (B, S, D_MODEL), jnp.float32)
    # mark the last item of the second outfit as padding
    attention_mask = jnp.zeros((B, S), dtype=bool).at[1, -1].set(True)

    fwd = jax.jit(outfit_transformer_cp)
    y = jax.block_until_ready(fwd(params, x, attention_mask))
    assert y.shape == (B, 1)
    assert bool(jnp.all(jnp.isfinite(y))) and bool(jnp.all((y >= 0) & (y <= 1)))
    print("KERNEL_OK")
</pallas_src>

<mosaic_0001>
module attributes {stable_mosaic.version = 11 : i64} {
  func.func @outfit_transformer_kernel(%arg0: i32, %arg1: i32, %arg2: memref<1x16x128xf32, #tpu.memory_space<vmem>>, %arg3: memref<1x1x256xf32, #tpu.memory_space<vmem>>, %arg4: memref<256x128xbf16, #tpu.memory_space<vmem>>, %arg5: memref<1x128x384xbf16, #tpu.memory_space<vmem>>, %arg6: memref<1x1x384xf32, #tpu.memory_space<vmem>>, %arg7: memref<1x128x128xbf16, #tpu.memory_space<vmem>>, %arg8: memref<1x1x128xf32, #tpu.memory_space<vmem>>, %arg9: memref<1x128x768xbf16, #tpu.memory_space<vmem>>, %arg10: memref<1x1x768xf32, #tpu.memory_space<vmem>>, %arg11: memref<1x768x128xbf16, #tpu.memory_space<vmem>>, %arg12: memref<1x1x128xf32, #tpu.memory_space<vmem>>, %arg13: memref<1x1x128xf32, #tpu.memory_space<vmem>>, %arg14: memref<1x1x128xf32, #tpu.memory_space<vmem>>, %arg15: memref<1x1x128xf32, #tpu.memory_space<vmem>>, %arg16: memref<1x1x128xf32, #tpu.memory_space<vmem>>, %arg17: memref<1x128xf32, #tpu.memory_space<vmem>>, %arg18: memref<1x128xf32, #tpu.memory_space<vmem>>, %arg19: memref<128x128xbf16, #tpu.memory_space<vmem>>, %arg20: memref<1x128xf32, #tpu.memory_space<vmem>>, %arg21: memref<128x1xbf16, #tpu.memory_space<vmem>>, %arg22: memref<1x1xf32, #tpu.memory_space<vmem>>, %arg23: memref<1x1x128xf32, #tpu.memory_space<vmem>>, %arg24: memref<16x128xf32, #tpu.memory_space<vmem>>) attributes {dimension_semantics = [#tpu.dimension_semantics<parallel>, #tpu.dimension_semantics<arbitrary>], iteration_bounds = array<i64: 2, 6>, scalar_prefetch = 0 : i64, scratch_operands = 1 : i64, tpu.core_type = #tpu.core_type<tc>, window_params = [{transform_indices = @transform_0, window_bounds = array<i64: 1, 16, 128>}, {transform_indices = @transform_1, window_bounds = array<i64: 1, 1, 256>}, {pipeline_mode = #tpu.pipeline_mode<synchronous>, transform_indices = @transform_2, window_bounds = array<i64: 256, 128>}, {transform_indices = @transform_3, window_bounds = array<i64: 1, 128, 384>}, {transform_indices = @transform_4, window_bounds = array<i64: 1, 1, 384>}, {transform_indices = @transform_5, window_bounds = array<i64: 1, 128, 128>}, {transform_indices = @transform_6, window_bounds = array<i64: 1, 1, 128>}, {transform_indices = @transform_7, window_bounds = array<i64: 1, 128, 768>}, {transform_indices = @transform_8, window_bounds = array<i64: 1, 1, 768>}, {transform_indices = @transform_9, window_bounds = array<i64: 1, 768, 128>}, {transform_indices = @transform_10, window_bounds = array<i64: 1, 1, 128>}, {transform_indices = @transform_11, window_bounds = array<i64: 1, 1, 128>}, {transform_indices = @transform_12, window_bounds = array<i64: 1, 1, 128>}, {transform_indices = @transform_13, window_bounds = array<i64: 1, 1, 128>}, {transform_indices = @transform_14, window_bounds = array<i64: 1, 1, 128>}, {pipeline_mode = #tpu.pipeline_mode<synchronous>, transform_indices = @transform_15, window_bounds = array<i64: 1, 128>}, {pipeline_mode = #tpu.pipeline_mode<synchronous>, transform_indices = @transform_16, window_bounds = array<i64: 1, 128>}, {pipeline_mode = #tpu.pipeline_mode<synchronous>, transform_indices = @transform_17, window_bounds = array<i64: 128, 128>}, {pipeline_mode = #tpu.pipeline_mode<synchronous>, transform_indices = @transform_18, window_bounds = array<i64: 1, 128>}, {pipeline_mode = #tpu.pipeline_mode<synchronous>, transform_indices = @transform_19, window_bounds = array<i64: 128, 1>}, {pipeline_mode = #tpu.pipeline_mode<synchronous>, transform_indices = @transform_20, window_bounds = array<i64: 1, 1>}, {transform_indices = @transform_21, window_bounds = array<i64: 1, 1, 128>}]} {
    %c0_i32 = arith.constant 0 : i32
    %0 = arith.cmpi eq, %arg1, %c0_i32 : i32
    %1 = arith.extui %0 : i1 to i32
    %c0_i32_0 = arith.constant 0 : i32
    %2 = arith.cmpi ne, %1, %c0_i32_0 : i32
    scf.if %2 {
      %c0_64 = arith.constant 0 : index
      %c0_65 = arith.constant 0 : index
      %c0_66 = arith.constant 0 : index
      %138 = vector.load %arg2[%c0_64, %c0_65, %c0_66] : memref<1x16x128xf32, #tpu.memory_space<vmem>>, vector<1x16x128xf32>
      %139 = vector.shape_cast %138 : vector<1x16x128xf32> to vector<16x128xf32>
      %c0_67 = arith.constant 0 : index
      %c0_68 = arith.constant 0 : index
      %140 = vector.load %arg24[%c0_67, %c0_68] : memref<16x128xf32, #tpu.memory_space<vmem>>, vector<16x128xf32>
      tpu.vector_store %arg24[%c0_67, %c0_68], %139 {strides = array<i32>} : memref<16x128xf32, #tpu.memory_space<vmem>>, vector<16x128xf32>,
    } else {
    }
    %c0 = arith.constant 0 : index
    %c0_1 = arith.constant 0 : index
    %3 = vector.load %arg24[%c0, %c0_1] : memref<16x128xf32, #tpu.memory_space<vmem>>, vector<16x128xf32>
    %c0_2 = arith.constant 0 : index
    %c0_3 = arith.constant 0 : index
    %c0_4 = arith.constant 0 : index
    %4 = vector.load %arg3[%c0_2, %c0_3, %c0_4] : memref<1x1x256xf32, #tpu.memory_space<vmem>>, vector<1x1x256xf32>
    %c0_5 = arith.constant 0 : index
    %c0_6 = arith.constant 0 : index
    %5 = vector.load %arg4[%c0_5, %c0_6] : memref<256x128xbf16, #tpu.memory_space<vmem>>, vector<256x128xbf16>
    %c0_7 = arith.constant 0 : index
    %c0_8 = arith.constant 0 : index
    %c0_9 = arith.constant 0 : index
    %6 = vector.load %arg5[%c0_7, %c0_8, %c0_9] : memref<1x128x384xbf16, #tpu.memory_space<vmem>>, vector<1x128x384xbf16>
    %7 = vector.shape_cast %6 : vector<1x128x384xbf16> to vector<128x384xbf16>
    %8 = arith.truncf %3 : vector<16x128xf32> to vector<16x128xbf16>
    %cst = arith.constant dense<0.000000e+00> : vector<16x384xf32>
    %9 = tpu.matmul %8, %7, %cst {dimension_numbers = #tpu.dot_dimension_numbers<[1], [0], [0], [1], [0, 0, 1, 1], [], []>} : vector<16x128xbf16>, vector<128x384xbf16>, vector<16x384xf32> -> vector<16x384xf32>
    %c0_10 = arith.constant 0 : index
    %c0_11 = arith.constant 0 : index
    %c0_12 = arith.constant 0 : index
    %10 = vector.load %arg6[%c0_10, %c0_11, %c0_12] : memref<1x1x384xf32, #tpu.memory_space<vmem>>, vector<1x1x384xf32>
    %11 = vector.shape_cast %10 : vector<1x1x384xf32> to vector<1x384xf32>
    %12 = vector.broadcast %11 : vector<1x384xf32> to vector<16x384xf32>
    %13 = arith.addf %9, %12 : vector<16x384xf32>
    %14 = vector.extract_strided_slice %13 {offsets = [0, 0], sizes = [16, 128], strides = [1, 1]} : vector<16x384xf32> to vector<16x128xf32>
    %15 = vector.shape_cast %14 : vector<16x128xf32> to vector<1x16x128xf32>
    %16 = arith.truncf %15 : vector<1x16x128xf32> to vector<1x16x128xbf16>
    %17 = vector.extract_strided_slice %13 {offsets = [0, 128], sizes = [16, 128], strides = [1, 1]} : vector<16x384xf32> to vector<16x128xf32>
    %18 = vector.shape_cast %17 : vector<16x128xf32> to vector<1x16x128xf32>
    %19 = arith.truncf %18 : vector<1x16x128xf32> to vector<1x16x128xbf16>
    %20 = vector.extract_strided_slice %13 {offsets = [0, 256], sizes = [16, 128], strides = [1, 1]} : vector<16x384xf32> to vector<16x128xf32>
    %21 = vector.shape_cast %20 : vector<16x128xf32> to vector<1x16x128xf32>
    %22 = arith.truncf %21 : vector<1x16x128xf32> to vector<1x16x128xbf16>
    %23 = vector.shape_cast %19 : vector<1x16x128xbf16> to vector<1x1x16x128xbf16>
    %24 = vector.shape_cast %23 : vector<1x1x16x128xbf16> to vector<1x1x16x128xbf16>
    %25 = vector.broadcast %24 : vector<1x1x16x128xbf16> to vector<1x16x16x128xbf16>
    %26 = vector.shape_cast %25 : vector<1x16x16x128xbf16> to vector<1x256x128xbf16>
    %27 = vector.shape_cast %5 : vector<256x128xbf16> to vector<1x256x128xbf16>
    %28 = arith.mulf %26, %27 : vector<1x256x128xbf16>
    %29 = vector.shape_cast %22 : vector<1x16x128xbf16> to vector<1x1x16x128xbf16>
    %30 = vector.shape_cast %29 : vector<1x1x16x128xbf16> to vector<1x1x16x128xbf16>
    %31 = vector.broadcast %30 : vector<1x1x16x128xbf16> to vector<1x16x16x128xbf16>
    %32 = vector.shape_cast %31 : vector<1x16x16x128xbf16> to vector<1x256x128xbf16>
    %33 = vector.shape_cast %5 : vector<256x128xbf16> to vector<1x256x128xbf16>
    %34 = arith.mulf %32, %33 : vector<1x256x128xbf16>
    %35 = vector.shape_cast %5 : vector<256x128xbf16> to vector<1x256x128xbf16>
    %36 = tpu.concatenate %34, %35 in 2 : vector<1x256x128xbf16>, vector<1x256x128xbf16> -> vector<1x256x256xbf16>
    "tpu.trace_start"() <{level = 10 : i32, message = "bil,bcl->bic"}> : () -> ()
    %cst_13 = arith.constant dense<0.000000e+00> : vector<1x16x256xf32>
    %37 = tpu.matmul %16, %28, %cst_13 {dimension_numbers = #tpu.dot_dimension_numbers<[2], [2], [1], [1], [0, 0, 0, 1, 1, 1], [0], [0]>} : vector<1x16x128xbf16>, vector<1x256x128xbf16>, vector<1x16x256xf32> -> vector<1x16x256xf32>
    "tpu.trace_stop"() : () -> ()
    %38 = vector.broadcast %4 : vector<1x1x256xf32> to vector<1x16x256xf32>
    %39 = arith.addf %37, %38 : vector<1x16x256xf32>
    %cst_14 = arith.constant dense<0xFF800000> : vector<1x16xf32>
    %40 = vector.multi_reduction <maximumf>, %39, %cst_14 [2] : vector<1x16x256xf32> to vector<1x16xf32>
    %41 = vector.shape_cast %40 : vector<1x16xf32> to vector<1x16x1xf32>
    %42 = vector.broadcast %41 : vector<1x16x1xf32> to vector<1x16x256xf32>
    %43 = arith.subf %39, %42 : vector<1x16x256xf32>
    %44 = math.exp %43 : vector<1x16x256xf32>
    %45 = arith.truncf %44 : vector<1x16x256xf32> to vector<1x16x256xbf16>
    "tpu.trace_start"() <{level = 10 : i32, message = "bic,bcl->bil"}> : () -> ()
    %cst_15 = arith.constant dense<0.000000e+00> : vector<1x16x256xf32>
    %46 = tpu.matmul %45, %36, %cst_15 {dimension_numbers = #tpu.dot_dimension_numbers<[2], [1], [1], [2], [0, 0, 0, 1, 1, 2], [0], [0]>} : vector<1x16x256xbf16>, vector<1x256x256xbf16>, vector<1x16x256xf32> -> vector<1x16x256xf32>
    "tpu.trace_stop"() : () -> ()
    %47 = vector.extract_strided_slice %46 {offsets = [0, 0, 128], sizes = [1, 16, 128], strides = [1, 1, 1]} : vector<1x16x256xf32> to vector<1x16x128xf32>
    %cst_16 = arith.constant 1.000000e-30 : f32
    %48 = vector.broadcast %cst_16 : f32 to vector<1x16x128xf32>
    %49 = arith.maximumf %47, %48 : vector<1x16x128xf32>
    %50 = vector.extract_strided_slice %46 {offsets = [0, 0, 0], sizes = [1, 16, 128], strides = [1, 1, 1]} : vector<1x16x256xf32> to vector<1x16x128xf32>
    %51 = tpu.reciprocal %49 {approx = true} : vector<1x16x128xf32> -> vector<1x16x128xf32>
    %52 = arith.mulf %50, %51 : vector<1x16x128xf32>
    %53 = vector.shape_cast %52 : vector<1x16x128xf32> to vector<16x128xf32>
    %c0_17 = arith.constant 0 : index
    %c0_18 = arith.constant 0 : index
    %c0_19 = arith.constant 0 : index
    %54 = vector.load %arg7[%c0_17, %c0_18, %c0_19] : memref<1x128x128xbf16, #tpu.memory_space<vmem>>, vector<1x128x128xbf16>
    %55 = vector.shape_cast %54 : vector<1x128x128xbf16> to vector<128x128xbf16>
    %56 = arith.truncf %53 : vector<16x128xf32> to vector<16x128xbf16>
    %cst_20 = arith.constant dense<0.000000e+00> : vector<16x128xf32>
    %57 = tpu.matmul %56, %55, %cst_20 {dimension_numbers = #tpu.dot_dimension_numbers<[1], [0], [0], [1], [0, 0, 1, 1], [], []>} : vector<16x128xbf16>, vector<128x128xbf16>, vector<16x128xf32> -> vector<16x128xf32>
    %c0_21 = arith.constant 0 : index
    %c0_22 = arith.constant 0 : index
    %c0_23 = arith.constant 0 : index
    %58 = vector.load %arg8[%c0_21, %c0_22, %c0_23] : memref<1x1x128xf32, #tpu.memory_space<vmem>>, vector<1x1x128xf32>
    %59 = vector.shape_cast %58 : vector<1x1x128xf32> to vector<1x128xf32>
    %60 = vector.broadcast %59 : vector<1x128xf32> to vector<16x128xf32>
    %61 = arith.addf %57, %60 : vector<16x128xf32>
    %62 = arith.addf %3, %61 : vector<16x128xf32>
    %c0_24 = arith.constant 0 : index
    %c0_25 = arith.constant 0 : index
    %c0_26 = arith.constant 0 : index
    %63 = vector.load %arg13[%c0_24, %c0_25, %c0_26] : memref<1x1x128xf32, #tpu.memory_space<vmem>>, vector<1x1x128xf32>
    %64 = vector.shape_cast %63 : vector<1x1x128xf32> to vector<1x128xf32>
    %c0_27 = arith.constant 0 : index
    %c0_28 = arith.constant 0 : index
    %c0_29 = arith.constant 0 : index
    %65 = vector.load %arg14[%c0_27, %c0_28, %c0_29] : memref<1x1x128xf32, #tpu.memory_space<vmem>>, vector<1x1x128xf32>
    %66 = vector.shape_cast %65 : vector<1x1x128xf32> to vector<1x128xf32>
    %cst_30 = arith.constant dense<0.000000e+00> : vector<16xf32>
    %67 = vector.multi_reduction <add>, %62, %cst_30 [1] : vector<16x128xf32> to vector<16xf32>
    %68 = vector.shape_cast %67 : vector<16xf32> to vector<16x1xf32>
    %cst_31 = arith.constant 1.280000e+02 : f32
    %69 = vector.broadcast %cst_31 : f32 to vector<16x1xf32>
    %70 = arith.divf %68, %69 : vector<16x1xf32>
    %71 = vector.broadcast %70 : vector<16x1xf32> to vector<16x128xf32>
    %72 = arith.subf %62, %71 : vector<16x128xf32>
    %73 = arith.mulf %72, %72 : vector<16x128xf32>
    %cst_32 = arith.constant dense<0.000000e+00> : vector<16xf32>
    %74 = vector.multi_reduction <add>, %73, %cst_32 [1] : vector<16x128xf32> to vector<16xf32>
    %75 = vector.shape_cast %74 : vector<16xf32> to vector<16x1xf32>
    %cst_33 = arith.constant 1.280000e+02 : f32
    %76 = vector.broadcast %cst_33 : f32 to vector<16x1xf32>
    %77 = arith.divf %75, %76 : vector<16x1xf32>
    %78 = vector.broadcast %70 : vector<16x1xf32> to vector<16x128xf32>
    %79 = arith.subf %62, %78 : vector<16x128xf32>
    %cst_34 = arith.constant 9.99999974E-6 : f32
    %80 = vector.broadcast %cst_34 : f32 to vector<16x1xf32>
    %81 = arith.addf %77, %80 : vector<16x1xf32>
    %82 = math.rsqrt %81 : vector<16x1xf32>
    %83 = vector.broadcast %82 : vector<16x1xf32> to vector<16x128xf32>
    %84 = arith.mulf %79, %83 : vector<16x128xf32>
    %85 = vector.broadcast %64 : vector<1x128xf32> to vector<16x128xf32>
    %86 = arith.mulf %84, %85 : vector<16x128xf32>
    %87 = vector.broadcast %66 : vector<1x128xf32> to vector<16x128xf32>
    %88 = arith.addf %86, %87 : vector<16x128xf32>
    %c0_35 = arith.constant 0 : index
    %c0_36 = arith.constant 0 : index
    %c0_37 = arith.constant 0 : index
    %89 = vector.load %arg9[%c0_35, %c0_36, %c0_37] : memref<1x128x768xbf16, #tpu.memory_space<vmem>>, vector<1x128x768xbf16>
    %90 = vector.shape_cast %89 : vector<1x128x768xbf16> to vector<128x768xbf16>
    %91 = arith.truncf %88 : vector<16x128xf32> to vector<16x128xbf16>
    %cst_38 = arith.constant dense<0.000000e+00> : vector<16x768xf32>
    %92 = tpu.matmul %91, %90, %cst_38 {dimension_numbers = #tpu.dot_dimension_numbers<[1], [0], [0], [1], [0, 0, 1, 1], [], []>} : vector<16x128xbf16>, vector<128x768xbf16>, vector<16x768xf32> -> vector<16x768xf32>
    %c0_39 = arith.constant 0 : index
    %c0_40 = arith.constant 0 : index
    %c0_41 = arith.constant 0 : index
    %93 = vector.load %arg10[%c0_39, %c0_40, %c0_41] : memref<1x1x768xf32, #tpu.memory_space<vmem>>, vector<1x1x768xf32>
    %94 = vector.shape_cast %93 : vector<1x1x768xf32> to vector<1x768xf32>
    %95 = vector.broadcast %94 : vector<1x768xf32> to vector<16x768xf32>
    %96 = arith.addf %92, %95 : vector<16x768xf32>
    %cst_42 = arith.constant 0.000000e+00 : f32
    %97 = vector.broadcast %cst_42 : f32 to vector<16x768xf32>
    %98 = arith.maximumf %96, %97 : vector<16x768xf32>
    %c0_43 = arith.constant 0 : index
    %c0_44 = arith.constant 0 : index
    %c0_45 = arith.constant 0 : index
    %99 = vector.load %arg11[%c0_43, %c0_44, %c0_45] : memref<1x768x128xbf16, #tpu.memory_space<vmem>>, vector<1x768x128xbf16>
    %100 = vector.shape_cast %99 : vector<1x768x128xbf16> to vector<768x128xbf16>
    %101 = arith.truncf %98 : vector<16x768xf32> to vector<16x768xbf16>
    %cst_46 = arith.constant dense<0.000000e+00> : vector<16x128xf32>
    %102 = tpu.matmul %101, %100, %cst_46 {dimension_numbers = #tpu.dot_dimension_numbers<[1], [0], [0], [1], [0, 0, 1, 1], [], []>} : vector<16x768xbf16>, vector<768x128xbf16>, vector<16x128xf32> -> vector<16x128xf32>
    %c0_47 = arith.constant 0 : index
    %c0_48 = arith.constant 0 : index
    %c0_49 = arith.constant 0 : index
    %103 = vector.load %arg12[%c0_47, %c0_48, %c0_49] : memref<1x1x128xf32, #tpu.memory_space<vmem>>, vector<1x1x128xf32>
    %104 = vector.shape_cast %103 : vector<1x1x128xf32> to vector<1x128xf32>
    %105 = vector.broadcast %104 : vector<1x128xf32> to vector<16x128xf32>
    %106 = arith.addf %102, %105 : vector<16x128xf32>
    %107 = arith.addf %88, %106 : vector<16x128xf32>
    %c0_50 = arith.constant 0 : index
    %c0_51 = arith.constant 0 : index
    %c0_52 = arith.constant 0 : index
    %108 = vector.load %arg15[%c0_50, %c0_51, %c0_52] : memref<1x1x128xf32, #tpu.memory_space<vmem>>, vector<1x1x128xf32>
    %109 = vector.shape_cast %108 : vector<1x1x128xf32> to vector<1x128xf32>
    %c0_53 = arith.constant 0 : index
    %c0_54 = arith.constant 0 : index
    %c0_55 = arith.constant 0 : index
    %110 = vector.load %arg16[%c0_53, %c0_54, %c0_55] : memref<1x1x128xf32, #tpu.memory_space<vmem>>, vector<1x1x128xf32>
    %111 = vector.shape_cast %110 : vector<1x1x128xf32> to vector<1x128xf32>
    %cst_56 = arith.constant dense<0.000000e+00> : vector<16xf32>
    %112 = vector.multi_reduction <add>, %107, %cst_56 [1] : vector<16x128xf32> to vector<16xf32>
    %113 = vector.shape_cast %112 : vector<16xf32> to vector<16x1xf32>
    %cst_57 = arith.constant 1.280000e+02 : f32
    %114 = vector.broadcast %cst_57 : f32 to vector<16x1xf32>
    %115 = arith.divf %113, %114 : vector<16x1xf32>
    %116 = vector.broadcast %115 : vector<16x1xf32> to vector<16x128xf32>
    %117 = arith.subf %107, %116 : vector<16x128xf32>
    %118 = arith.mulf %117, %117 : vector<16x128xf32>
    %cst_58 = arith.constant dense<0.000000e+00> : vector<16xf32>
    %119 = vector.multi_reduction <add>, %118, %cst_58 [1] : vector<16x128xf32> to vector<16xf32>
    %120 = vector.shape_cast %119 : vector<16xf32> to vector<16x1xf32>
    %cst_59 = arith.constant 1.280000e+02 : f32
    %121 = vector.broadcast %cst_59 : f32 to vector<16x1xf32>
    %122 = arith.divf %120, %121 : vector<16x1xf32>
    %123 = vector.broadcast %115 : vector<16x1xf32> to vector<16x128xf32>
    %124 = arith.subf %107, %123 : vector<16x128xf32>
    %cst_60 = arith.constant 9.99999974E-6 : f32
    %125 = vector.broadcast %cst_60 : f32 to vector<16x1xf32>
    %126 = arith.addf %122, %125 : vector<16x1xf32>
    %127 = math.rsqrt %126 : vector<16x1xf32>
    %128 = vector.broadcast %127 : vector<16x1xf32> to vector<16x128xf32>
    %129 = arith.mulf %124, %128 : vector<16x128xf32>
    %130 = vector.broadcast %109 : vector<1x128xf32> to vector<16x128xf32>
    %131 = arith.mulf %129, %130 : vector<16x128xf32>
    %132 = vector.broadcast %111 : vector<1x128xf32> to vector<16x128xf32>
    %133 = arith.addf %131, %132 : vector<16x128xf32>
    %c0_61 = arith.constant 0 : index
    %c0_62 = arith.constant 0 : index
    %134 = vector.load %arg24[%c0_61, %c0_62] : memref<16x128xf32, #tpu.memory_space<vmem>>, vector<16x128xf32>
    tpu.vector_store %arg24[%c0_61, %c0_62], %133 {strides = array<i32>} : memref<16x128xf32, #tpu.memory_space<vmem>>, vector<16x128xf32>,
    %c5_i32 = arith.constant 5 : i32
    %135 = arith.cmpi eq, %arg1, %c5_i32 : i32
    %136 = arith.extui %135 : i1 to i32
    %c0_i32_63 = arith.constant 0 : i32
    %137 = arith.cmpi ne, %136, %c0_i32_63 : i32
    scf.if %137 {
      %c0_64 = arith.constant 0 : index
      %c0_65 = arith.constant 0 : index
      %138 = vector.load %arg17[%c0_64, %c0_65] : memref<1x128xf32, #tpu.memory_space<vmem>>, vector<1x128xf32>
      %c0_66 = arith.constant 0 : index
      %c0_67 = arith.constant 0 : index
      %139 = vector.load %arg18[%c0_66, %c0_67] : memref<1x128xf32, #tpu.memory_space<vmem>>, vector<1x128xf32>
      %cst_68 = arith.constant dense<0.000000e+00> : vector<16xf32>
      %140 = vector.multi_reduction <add>, %133, %cst_68 [1] : vector<16x128xf32> to vector<16xf32>
      %141 = vector.shape_cast %140 : vector<16xf32> to vector<16x1xf32>
      %cst_69 = arith.constant 1.280000e+02 : f32
      %142 = vector.broadcast %cst_69 : f32 to vector<16x1xf32>
      %143 = arith.divf %141, %142 : vector<16x1xf32>
      %144 = vector.broadcast %143 : vector<16x1xf32> to vector<16x128xf32>
      %145 = arith.subf %133, %144 : vector<16x128xf32>
      %146 = arith.mulf %145, %145 : vector<16x128xf32>
      %cst_70 = arith.constant dense<0.000000e+00> : vector<16xf32>
      %147 = vector.multi_reduction <add>, %146, %cst_70 [1] : vector<16x128xf32> to vector<16xf32>
      %148 = vector.shape_cast %147 : vector<16xf32> to vector<16x1xf32>
      %cst_71 = arith.constant 1.280000e+02 : f32
      %149 = vector.broadcast %cst_71 : f32 to vector<16x1xf32>
      %150 = arith.divf %148, %149 : vector<16x1xf32>
      %151 = vector.broadcast %143 : vector<16x1xf32> to vector<16x128xf32>
      %152 = arith.subf %133, %151 : vector<16x128xf32>
      %cst_72 = arith.constant 9.99999974E-6 : f32
      %153 = vector.broadcast %cst_72 : f32 to vector<16x1xf32>
      %154 = arith.addf %150, %153 : vector<16x1xf32>
      %155 = math.rsqrt %154 : vector<16x1xf32>
      %156 = vector.broadcast %155 : vector<16x1xf32> to vector<16x128xf32>
      %157 = arith.mulf %152, %156 : vector<16x128xf32>
      %158 = vector.broadcast %138 : vector<1x128xf32> to vector<16x128xf32>
      %159 = arith.mulf %157, %158 : vector<16x128xf32>
      %160 = vector.broadcast %139 : vector<1x128xf32> to vector<16x128xf32>
      %161 = arith.addf %159, %160 : vector<16x128xf32>
      %162 = vector.shape_cast %161 : vector<16x128xf32> to vector<1x16x128xf32>
      %163 = vector.extract_strided_slice %162 {offsets = [0, 0, 0], sizes = [1, 1, 128], strides = [1, 1, 1]} : vector<1x16x128xf32> to vector<1x1x128xf32>
      %164 = vector.shape_cast %163 : vector<1x1x128xf32> to vector<1x128xf32>
      %cst_73 = arith.constant 0.000000e+00 : f32
      %165 = vector.broadcast %cst_73 : f32 to vector<1x128xf32>
      %166 = arith.cmpf ogt, %164, %165 : vector<1x128xf32>
      %cst_74 = arith.constant 0.00999999977 : f32
      %167 = vector.broadcast %cst_74 : f32 to vector<1x128xf32>
      %168 = arith.mulf %167, %164 : vector<1x128xf32>
      %169 = arith.select %166, %164, %168 : vector<1x128xi1>, vector<1x128xf32>
      %c0_75 = arith.constant 0 : index
      %c0_76 = arith.constant 0 : index
      %170 = vector.load %arg19[%c0_75, %c0_76] : memref<128x128xbf16, #tpu.memory_space<vmem>>, vector<128x128xbf16>
      %171 = arith.truncf %169 : vector<1x128xf32> to vector<1x128xbf16>
      %cst_77 = arith.constant dense<0.000000e+00> : vector<1x128xf32>
      %172 = tpu.matmul %171, %170, %cst_77 {dimension_numbers = #tpu.dot_dimension_numbers<[1], [0], [0], [1], [0, 0, 1, 1], [], []>} : vector<1x128xbf16>, vector<128x128xbf16>, vector<1x128xf32> -> vector<1x128xf32>
      %c0_78 = arith.constant 0 : index
      %c0_79 = arith.constant 0 : index
      %173 = vector.load %arg20[%c0_78, %c0_79] : memref<1x128xf32, #tpu.memory_space<vmem>>, vector<1x128xf32>
      %174 = arith.addf %172, %173 : vector<1x128xf32>
      %cst_80 = arith.constant 0.000000e+00 : f32
      %175 = vector.broadcast %cst_80 : f32 to vector<1x128xf32>
      %176 = arith.cmpf ogt, %174, %175 : vector<1x128xf32>
      %cst_81 = arith.constant 0.00999999977 : f32
      %177 = vector.broadcast %cst_81 : f32 to vector<1x128xf32>
      %178 = arith.mulf %177, %174 : vector<1x128xf32>
      %179 = arith.select %176, %174, %178 : vector<1x128xi1>, vector<1x128xf32>
      %c0_82 = arith.constant 0 : index
      %c0_83 = arith.constant 0 : index
      %180 = vector.load %arg21[%c0_82, %c0_83] : memref<128x1xbf16, #tpu.memory_space<vmem>>, vector<128x1xbf16>
      %181 = arith.truncf %179 : vector<1x128xf32> to vector<1x128xbf16>
      %cst_84 = arith.constant dense<0.000000e+00> : vector<1x1xf32>
      %182 = tpu.matmul %181, %180, %cst_84 {dimension_numbers = #tpu.dot_dimension_numbers<[1], [0], [0], [1], [0, 0, 1, 1], [], []>} : vector<1x128xbf16>, vector<128x1xbf16>, vector<1x1xf32> -> vector<1x1xf32>
      %c0_85 = arith.constant 0 : index
      %c0_86 = arith.constant 0 : index
      %183 = vector.load %arg22[%c0_85, %c0_86] : memref<1x1xf32, #tpu.memory_space<vmem>>, vector<1x1xf32>
      %184 = arith.addf %182, %183 : vector<1x1xf32>
      %cst_87 = arith.constant 0.000000e+00 : f32
      %185 = vector.broadcast %cst_87 : f32 to vector<1x1xf32>
      %186 = arith.subf %185, %184 : vector<1x1xf32>
      %187 = math.exp %186 : vector<1x1xf32>
      %cst_88 = arith.constant 1.000000e+00 : f32
      %188 = vector.broadcast %cst_88 : f32 to vector<1x1xf32>
      %189 = arith.addf %188, %187 : vector<1x1xf32>
      %cst_89 = arith.constant 1.000000e+00 : f32
      %190 = vector.broadcast %cst_89 : f32 to vector<1x1xf32>
      %191 = arith.divf %190, %189 : vector<1x1xf32>
      %192 = vector.shape_cast %191 : vector<1x1xf32> to vector<1x1x1xf32>
      %193 = vector.shape_cast %192 : vector<1x1x1xf32> to vector<1x1x1xf32>
      %194 = vector.broadcast %193 : vector<1x1x1xf32> to vector<1x1x128xf32>
      %c0_90 = arith.constant 0 : index
      %c0_91 = arith.constant 0 : index
      %c0_92 = arith.constant 0 : index
      %195 = vector.load %arg23[%c0_90, %c0_91, %c0_92] : memref<1x1x128xf32, #tpu.memory_space<vmem>>, vector<1x1x128xf32>
      tpu.vector_store %arg23[%c0_90, %c0_91, %c0_92], %194 {strides = array<i32>} : memref<1x1x128xf32, #tpu.memory_space<vmem>>, vector<1x1x128xf32>,
    } else {
    }
    return
  }
  func.func @transform_0(%arg0: i32, %arg1: i32) -> (i32, i32, i32) {
    %c0_i32 = arith.constant 0 : i32
    %c0_i32_0 = arith.constant 0 : i32
    %c0_i32_1 = arith.constant 0 : i32
    return %arg0, %c0_i32, %c0_i32_0 : i32, i32, i32
  }
  func.func @transform_1(%arg0: i32, %arg1: i32) -> (i32, i32, i32) {
    %c0_i32 = arith.constant 0 : i32
    %c0_i32_0 = arith.constant 0 : i32
    %c0_i32_1 = arith.constant 0 : i32
    return %arg0, %c0_i32, %c0_i32_0 : i32, i32, i32
  }
  func.func @transform_2(%arg0: i32, %arg1: i32) -> (i32, i32) {
    %c0_i32 = arith.constant 0 : i32
    %c0_i32_0 = arith.constant 0 : i32
    %c0_i32_1 = arith.constant 0 : i32
    return %c0_i32, %c0_i32_0 : i32, i32
  }
  func.func @transform_3(%arg0: i32, %arg1: i32) -> (i32, i32, i32) {
    %c0_i32 = arith.constant 0 : i32
    %c0_i32_0 = arith.constant 0 : i32
    %c0_i32_1 = arith.constant 0 : i32
    return %arg1, %c0_i32, %c0_i32_0 : i32, i32, i32
  }
  func.func @transform_4(%arg0: i32, %arg1: i32) -> (i32, i32, i32) {
    %c0_i32 = arith.constant 0 : i32
    %c0_i32_0 = arith.constant 0 : i32
    %c0_i32_1 = arith.constant 0 : i32
    return %arg1, %c0_i32, %c0_i32_0 : i32, i32, i32
  }
  func.func @transform_5(%arg0: i32, %arg1: i32) -> (i32, i32, i32) {
    %c0_i32 = arith.constant 0 : i32
    %c0_i32_0 = arith.constant 0 : i32
    %c0_i32_1 = arith.constant 0 : i32
    return %arg1, %c0_i32, %c0_i32_0 : i32, i32, i32
  }
  func.func @transform_6(%arg0: i32, %arg1: i32) -> (i32, i32, i32) {
    %c0_i32 = arith.constant 0 : i32
    %c0_i32_0 = arith.constant 0 : i32
    %c0_i32_1 = arith.constant 0 : i32
    return %arg1, %c0_i32, %c0_i32_0 : i32, i32, i32
  }
  func.func @transform_7(%arg0: i32, %arg1: i32) -> (i32, i32, i32) {
    %c0_i32 = arith.constant 0 : i32
    %c0_i32_0 = arith.constant 0 : i32
    %c0_i32_1 = arith.constant 0 : i32
    return %arg1, %c0_i32, %c0_i32_0 : i32, i32, i32
  }
  func.func @transform_8(%arg0: i32, %arg1: i32) -> (i32, i32, i32) {
    %c0_i32 = arith.constant 0 : i32
    %c0_i32_0 = arith.constant 0 : i32
    %c0_i32_1 = arith.constant 0 : i32
    return %arg1, %c0_i32, %c0_i32_0 : i32, i32, i32
  }
  func.func @transform_9(%arg0: i32, %arg1: i32) -> (i32, i32, i32) {
    %c0_i32 = arith.constant 0 : i32
    %c0_i32_0 = arith.constant 0 : i32
    %c0_i32_1 = arith.constant 0 : i32
    return %arg1, %c0_i32, %c0_i32_0 : i32, i32, i32
  }
  func.func @transform_10(%arg0: i32, %arg1: i32) -> (i32, i32, i32) {
    %c0_i32 = arith.constant 0 : i32
    %c0_i32_0 = arith.constant 0 : i32
    %c0_i32_1 = arith.constant 0 : i32
    return %arg1, %c0_i32, %c0_i32_0 : i32, i32, i32
  }
  func.func @transform_11(%arg0: i32, %arg1: i32) -> (i32, i32, i32) {
    %c0_i32 = arith.constant 0 : i32
    %c0_i32_0 = arith.constant 0 : i32
    %c0_i32_1 = arith.constant 0 : i32
    return %arg1, %c0_i32, %c0_i32_0 : i32, i32, i32
  }
  func.func @transform_12(%arg0: i32, %arg1: i32) -> (i32, i32, i32) {
    %c0_i32 = arith.constant 0 : i32
    %c0_i32_0 = arith.constant 0 : i32
    %c0_i32_1 = arith.constant 0 : i32
    return %arg1, %c0_i32, %c0_i32_0 : i32, i32, i32
  }
  func.func @transform_13(%arg0: i32, %arg1: i32) -> (i32, i32, i32) {
    %c0_i32 = arith.constant 0 : i32
    %c0_i32_0 = arith.constant 0 : i32
    %c0_i32_1 = arith.constant 0 : i32
    return %arg1, %c0_i32, %c0_i32_0 : i32, i32, i32
  }
  func.func @transform_14(%arg0: i32, %arg1: i32) -> (i32, i32, i32) {
    %c0_i32 = arith.constant 0 : i32
    %c0_i32_0 = arith.constant 0 : i32
    %c0_i32_1 = arith.constant 0 : i32
    return %arg1, %c0_i32, %c0_i32_0 : i32, i32, i32
  }
  func.func @transform_15(%arg0: i32, %arg1: i32) -> (i32, i32) {
    %c0_i32 = arith.constant 0 : i32
    %c0_i32_0 = arith.constant 0 : i32
    %c0_i32_1 = arith.constant 0 : i32
    return %c0_i32, %c0_i32_0 : i32, i32
  }
  func.func @transform_16(%arg0: i32, %arg1: i32) -> (i32, i32) {
    %c0_i32 = arith.constant 0 : i32
    %c0_i32_0 = arith.constant 0 : i32
    %c0_i32_1 = arith.constant 0 : i32
    return %c0_i32, %c0_i32_0 : i32, i32
  }
  func.func @transform_17(%arg0: i32, %arg1: i32) -> (i32, i32) {
    %c0_i32 = arith.constant 0 : i32
    %c0_i32_0 = arith.constant 0 : i32
    %c0_i32_1 = arith.constant 0 : i32
    return %c0_i32, %c0_i32_0 : i32, i32
  }
  func.func @transform_18(%arg0: i32, %arg1: i32) -> (i32, i32) {
    %c0_i32 = arith.constant 0 : i32
    %c0_i32_0 = arith.constant 0 : i32
    %c0_i32_1 = arith.constant 0 : i32
    return %c0_i32, %c0_i32_0 : i32, i32
  }
  func.func @transform_19(%arg0: i32, %arg1: i32) -> (i32, i32) {
    %c0_i32 = arith.constant 0 : i32
    %c0_i32_0 = arith.constant 0 : i32
    %c0_i32_1 = arith.constant 0 : i32
    return %c0_i32, %c0_i32_0 : i32, i32
  }
  func.func @transform_20(%arg0: i32, %arg1: i32) -> (i32, i32) {
    %c0_i32 = arith.constant 0 : i32
    %c0_i32_0 = arith.constant 0 : i32
    %c0_i32_1 = arith.constant 0 : i32
    return %c0_i32, %c0_i32_0 : i32, i32
  }
  func.func @transform_21(%arg0: i32, %arg1: i32) -> (i32, i32, i32) {
    %c0_i32 = arith.constant 0 : i32
    %c0_i32_0 = arith.constant 0 : i32
    %c0_i32_1 = arith.constant 0 : i32
    return %arg0, %c0_i32, %c0_i32_0 : i32, i32, i32
  }
}

</mosaic_0001>

<bundles_post_ra>
// kernel: outfit_transformer_cp.1
= control target key start
LH: loop header
LB: loop body
LE: loop exit
PB: predicated region body
PF: predicated region fallthrough
CT: control target
= control target key end

     0   :  { %s3897_s26 = smov 0   ;;  %s3899_s27 = smov 0   ;;  %s4444_s0 = inlined_call_operand.vmem [shape: f32[2,16,128], index: 0, kind: input, shape index: {}]   ;;  %s4445_s1 = inlined_call_operand.vmem [shape: f32[2,1,256], index: 1, kind: input, shape index: {}]   ;;  %s4446_s2 = inlined_call_operand.vmem [shape: bf16[256,128], index: 2, kind: input, shape index: {}]   ;;  %s4447_s3 = inlined_call_operand.vmem [shape: bf16[6,128,384], index: 3, kind: input, shape index: {}]   ;;  %s4448_s4 = inlined_call_operand.vmem [shape: f32[6,1,384], index: 4, kind: input, shape index: {}]   ;;  %s4449_s5 = inlined_call_operand.vmem [shape: bf16[6,128,128], index: 5, kind: input, shape index: {}]   ;;  %s4450_s6 = inlined_call_operand.vmem [shape: f32[6,1,128], index: 6, kind: input, shape index: {}]   ;;  %s4451_s7 = inlined_call_operand.vmem [shape: bf16[6,128,768], index: 7, kind: input, shape index: {}]   ;;  %s4452_s8 = inlined_call_operand.vmem [shape: f32[6,1,768], index: 8, kind: input, shape index: {}]   ;;  %s4453_s9 = inlined_call_operand.vmem [shape: bf16[6,768,128], index: 9, kind: input, shape index: {}]   ;;  %s4454_s10 = inlined_call_operand.vmem [shape: f32[6,1,128], index: 10, kind: input, shape index: {}]   ;;  %s4455_s11 = inlined_call_operand.vmem [shape: f32[6,1,128], index: 11, kind: input, shape index: {}]   ;;  %s4456_s12 = inlined_call_operand.vmem [shape: f32[6,1,128], index: 12, kind: input, shape index: {}]   ;;  %s4457_s13 = inlined_call_operand.vmem [shape: f32[6,1,128], index: 13, kind: input, shape index: {}]   ;;  %s4458_s14 = inlined_call_operand.vmem [shape: f32[6,1,128], index: 14, kind: input, shape index: {}]   ;;  %s4459_s15 = inlined_call_operand.vmem [shape: f32[1,128], index: 15, kind: input, shape index: {}]   ;;  %s4460_s16 = inlined_call_operand.vmem [shape: f32[1,128], index: 16, kind: input, shape index: {}]   ;;  %s4461_s17 = inlined_call_operand.vmem [shape: bf16[128,128], index: 17, kind: input, shape index: {}]   ;;  %s4462_s18 = inlined_call_operand.vmem [shape: f32[1,128], index: 18, kind: input, shape index: {}]   ;;  %s4463_s19 = inlined_call_operand.vmem [shape: bf16[128,1], index: 19, kind: input, shape index: {}]   ;;  %s4464_s20 = inlined_call_operand.<no memory space> [shape: f32[1,1], index: 20, kind: input, shape index: {}]   ;;  %s4465_s21 = inlined_call_operand.vmem [shape: f32[2,1,128], index: 21, kind: output, shape index: {}]  }
   0x1   :  { %4473 = sst [smem:[#allocation11_spill]] %s4444_s0  ;;  %v26_v0 = vstv %s4464_s20  ;;  %s3903_s28 = smov 0  }
   0x2   :  { %4474 = sst [smem:[#allocation12_spill]] %s4445_s1  ;;  %27 = vst [vmem:[#allocation3] sm:$0x1] %v26_v0  ;;  %s3905_s29 = smov 0  }
   0x3   :  { %4475 = sst [smem:[#allocation13_spill]] %s4446_s2 }
   0x4   :  { %4476 = sst [smem:[#allocation14_spill]] %s4447_s3  ;;  %s3901_s3 = smov 0  }
   0x5   :  { %4477 = sst [smem:[#allocation15_spill]] %s4448_s4 }
   0x6   :  { %4478 = sst [smem:[#allocation16_spill]] %s4449_s5 }
   0x7   :  { %4479 = sst [smem:[#allocation17_spill]] %s4451_s7 }
   0x8   :  { %4480 = sst [smem:[#allocation18_spill]] %s4452_s8 }
   0x9   :  { %4481 = sst [smem:[#allocation19_spill]] %s4453_s9 }
   0xa   :  { %4482 = sst [smem:[#allocation20_spill]] %s4454_s10 }
   0xb   :  { %4483 = sst [smem:[#allocation21_spill]] %s4457_s13 }
   0xc   :  { %4484 = sst [smem:[#allocation22_spill]] %s4458_s14 }
   0xd   :  { %4485 = sst [smem:[#allocation23_spill]] %s4459_s15 }
   0xe   :  { %4486 = sst [smem:[#allocation24_spill]] %s4460_s16 }
   0xf   :  { %4487 = sst [smem:[#allocation25_spill]] %s4461_s17 }
  0x10   :  { %4488 = sst [smem:[#allocation26_spill]] %s4462_s18 }
  0x11   :  { %4489 = sst [smem:[#allocation27_spill]] %s4463_s19 }
  0x12   :  { %4490 = sst [smem:[#allocation28_spill]] %s4465_s21 }
  0x13 LB: > { %4491 = sst [smem:[#allocation4_spill]] %s3760_s26  ;;  %s42_s20 = sadd.s32 1, %s3768_s3  ;;  %s3776_s29 = sphi %s3905_s29, %s33_s29   ;;  %s3772_s28 = sphi %s3903_s28, %s4529_s28   ;;  %s3768_s3 = sphi %s3901_s3, %s4528_s3   ;;  %s3764_s27 = sphi %s3899_s27, %s4527_s27   ;;  %s3760_s26 = sphi %s3897_s26, %s4526_s26  }
  0x14   : > { %4492 = sst [smem:[#allocation5_spill]] %s3768_s3  ;;  %s45_s0 = sadd.s32 1, %s3772_s28 }
  0x15   : > { %4493 = sst [smem:[#allocation6_spill]] %s3772_s28  ;;  %p43_p0 = scmp.ge.s32.totalorder %s42_s20, 6 }
  0x16   : > { %4494 = sst [smem:[#allocation7_spill]] %s3776_s29  ;;  %p3085_p1 = scmp.ge.s32.totalorder %s3776_s29, 1 }
  0x17   : > { %p716_p2 = scmp.lt.s32.totalorder %s3776_s29, 13  ;;  %s4531_s20 = smov (%p43_p0, %s42_s20), 0 }
  0x18   : > { %4495 = sst [smem:[#allocation8_spill]] %s4531_s20  ;;  %s4533_s0 = smov (!%p43_p0, %s45_s0), %s3772_s28 }
  0x19   : > { %p717_p3 = pnand %p3085_p1, %p716_p2  ;;  %p47_p4 = scmp.ge.s32.totalorder %s4533_s0, 2 }
  0x1b   : > { %s4535_s0 = smov (%p47_p4, %s4533_s0), 0  ;;  %720 = sbr.rel (%p717_p3) target bundleno = 3222 (0xc96), region = 104 }
  0x1c   : > { %4496 = sst [smem:[#allocation9_spill]] %s4535_s0 }
  0x22   : > { %p824_p5 = scmp.lt.s32.totalorder %s3764_s27, 1  ;;  %p833_p6 = scmp.lt.s32.totalorder %s3760_s26, 5 }
  0x23   : > { %s4497_s1 = sld [smem:[#allocation11_spill]]  ;;  %s4498_s0 = sld [smem:[#allocation12_spill]] }
  0x24   : > { %s4537_s27 = smov (!%p824_p5, %s3764_s27), 1  ;;  %s4500_s15 = sld [smem:[#allocation16_spill]] }
  0x25   : > { %s3933_s4 = scalar_select %p833_p6, %s3760_s26, 5 }
  0x26   : > { %s3266_s30 = sshll.u32 %s4537_s27, 4  ;;  %s3088_s5 = sshll.u32 %s4537_s27, 1 }
  0x27   : > { %s3468_s28 = smul.u32 192, %s3933_s4  ;;  %s3267_s3 = sshll.u32 %s3933_s4, 6 }
  0x28   : > { %s3469_s29 = smul.u32 3, %s3933_s4  ;;  %s4504_s7 = sld [smem:[#allocation17_spill]] }
  0x29   : > { %s828_s24 = scalar_lea.vmem %s4497_s1, %s3266_s30  ;;  %s3943_s20 = scalar_lea.vmem %s4498_s0, %s3088_s5 }
  0x2a   : > { %4499 = sst [smem:[#allocation10_spill]] %s3943_s20  ;;  %s3951_s19 = scalar_lea.vmem %s4500_s15, %s3267_s3 }
  0x2b   : > { %s4501_s30 = sld [smem:[#allocation14_spill]]  ;;  %s4502_s20 = sld [smem:[#allocation15_spill]] }
  0x2c   : > { %s3470_s21 = smul.u32 384, %s3933_s4  ;;  %s4505_s9 = sld [smem:[#allocation19_spill]] }
  0x2d   : > { %s3471_s14 = smul.u32 6, %s3933_s4  ;;  %s4506_s8 = sld [smem:[#allocation18_spill]] }
  0x2e   : > { %s869_s13 = scalar_lea.vmem %s4455_s11, %s3933_s4  ;;  %s872_s18 = scalar_lea.vmem %s4456_s12, %s3933_s4 }
  0x2f   : > { %s4507_s0 = sld [smem:[#allocation21_spill]]  ;;  %s4508_s23 = sld [smem:[#allocation22_spill]] }
  0x31   : > { %s3956_s1 = scalar_lea.vmem %s4501_s30, %s3468_s28  ;;  %s3965_s26 = scalar_lea.vmem %s4502_s20, %s3469_s29 }
  0x32   : > { %s3976_s28 = scalar_lea.vmem %s4504_s7, %s3470_s21  ;;  %s3981_s30 = scalar_lea.vmem %s4505_s9, %s3470_s21 }
  0x33   : > { %s3986_s29 = scalar_lea.vmem %s4506_s8, %s3471_s14  ;;  %s4509_s14 = sld [smem:[#allocation28_spill]] }
  0x34   : > { %s4510_s8 = sld [smem:[#allocation4_spill]] }
  0x35   : > { %s875_s7 = scalar_lea.vmem %s4507_s0, %s3933_s4  ;;  %s878_s9 = scalar_lea.vmem %s4508_s23, %s3933_s4 }
  0x39   : > { %s881_s17 = scalar_lea.vmem %s4509_s14, %s4537_s27 }
  0x3a   : > { %p3094_p7 = scmp.ne.s32.totalorder %s4510_s8, 0 }
  0x3b   : > { %v887_v1 = vld [vmem:[%s828_s24] sm:$0xff] (!%p3094_p7)  ;;  %v888_v2 = vld [vmem:[%s828_s24 + $0x8] sm:$0xff] (!%p3094_p7) }
  0x3c   : > { %886 = sbr.rel (%p3094_p7) target bundleno = 67 (0x43), region = 108  ;;  %889 = vst [vmem:[#allocation2] sm:$0xff] (!%p3094_p7), %v887_v1  ;;  %890 = vst [vmem:[#allocation2 + $0x8] sm:$0xff] (!%p3094_p7), %v888_v2 }
  0x43 PF: > { %v3518_v3 = vld [vmem:[%s3956_s1 + $0x4] ss:$12 sps:$4 sm:$0xff]   ;;  %v3520_v4 = vld [vmem:[%s3956_s1] ss:$12 sps:$4 sm:$0xff]   ;;  %v3778_v5 = vmov 0   ;;  %v3779_v24 = vmov 0.0   ;;  %v961_v33 = vlaneseq }
  0x44   : > { %1136 = vmatprep.mubr.bf16.mxu0 %v3778_v5  ;;  %1104 = vmatprep.subr.bf16.mxu0 %v3518_v3  ;;  %v3521_v6 = vld [vmem:[%s3956_s1 + $0x1c] ss:$12 sps:$4 sm:$0xff]   ;;  %v3523_v7 = vld [vmem:[%s3956_s1 + $0x18] ss:$12 sps:$4 sm:$0xff]   ;;  %v3524_v8 = vld [vmem:[%s3956_s1 + $0x34] ss:$12 sps:$4 sm:$0xff]  }
  0x45   : > { %1105 = vmatpush1.bf16.msra.mxu0 %v3520_v4  ;;  %v3526_v9 = vld [vmem:[%s3956_s1 + $0x30] ss:$12 sps:$4 sm:$0xff]   ;;  %v3527_v10 = vld [vmem:[%s3956_s1 + $0x4c] ss:$12 sps:$4 sm:$0xff]   ;;  %v3529_v11 = vld [vmem:[%s3956_s1 + $0x48] ss:$12 sps:$4 sm:$0xff]   ;;  %3388 = vmatprep.subr.bf16.mxu1 %v3779_v24 }
  0x46   : > { %1106 = vmatprep.subr.bf16.mxu0 %v3521_v6  ;;  %v3530_v12 = vld [vmem:[%s3956_s1 + $0x64] ss:$12 sps:$4 sm:$0xff]   ;;  %v3532_v13 = vld [vmem:[%s3956_s1 + $0x60] ss:$12 sps:$4 sm:$0xff]   ;;  %v3533_v14 = vld [vmem:[%s3956_s1 + $0x7c] ss:$12 sps:$4 sm:$0xff]  }
  0x47   : > { %v3535_v15 = vld [vmem:[%s3956_s1 + $0x78] ss:$12 sps:$4 sm:$0xff]   ;;  %v3536_v16 = vld [vmem:[%s3956_s1 + $0x94] ss:$12 sps:$4 sm:$0xff]   ;;  %v3538_v17 = vld [vmem:[%s3956_s1 + $0x90] ss:$12 sps:$4 sm:$0xff]  }
  0x48   : > { %v3539_v18 = vld [vmem:[%s3956_s1 + $0xac] ss:$12 sps:$4 sm:$0xff]   ;;  %v3541_v19 = vld [vmem:[%s3956_s1 + $0xa8] ss:$12 sps:$4 sm:$0xff]   ;;  %v4026_v20 = vld [vmem:[#allocation2] sm:$0xff]  ;;  %vm3780_vm0 = vmmov 0  }
  0x49   : > { %1107 = vmatpush1.bf16.msra.mxu0 %v3523_v7  ;;  %v4028_v21 = vld [vmem:[#allocation2 + $0x8] sm:$0xff]  ;;  %3404 = vmatprep.mubr.msk.bf16.mxu1 %vm3780_vm0, %v3779_v24  ;;  %v3560_v26 = vld [vmem:[%s3956_s1 + $0x38] ss:$12 sps:$4 sm:$0xff]   ;;  %v3561_v27 = vld [vmem:[%s3956_s1 + $0x50] ss:$12 sps:$4 sm:$0xff]   ;;  %s4511_s24 = sld [smem:[#allocation13_spill]] }
  0x4a   : > { %1108 = vmatprep.subr.bf16.mxu0 %v3524_v8  ;;  %v958_v22 = vpack.c.bf16 %v4028_v21, %v4026_v20  ;;  %v3558_v23 = vld [vmem:[%s3956_s1 + $0x8] ss:$12 sps:$4 sm:$0xff]   ;;  %v3559_v25 = vld [vmem:[%s3956_s1 + $0x20] ss:$12 sps:$4 sm:$0xff]   ;;  %v3564_v30 = vld [vmem:[%s3956_s1 + $0x98] ss:$12 sps:$4 sm:$0xff]  }
  0x4b   : > { %3389 = vmatpush3.bf16.msra.mxu1 %v3558_v23  ;;  %v3562_v28 = vld [vmem:[%s3956_s1 + $0x68] ss:$12 sps:$4 sm:$0xff]   ;;  %v3563_v29 = vld [vmem:[%s3956_s1 + $0x80] ss:$12 sps:$4 sm:$0xff]   ;;  %v3565_v31 = vld [vmem:[%s3956_s1 + $0xb0] ss:$12 sps:$4 sm:$0xff]   ;;  %s4513_s1 = scalar_lea.vmem %s4450_s6, %s3933_s4 }
  0x4c   : > { %3390 = vmatprep.subr.bf16.mxu1 %v3779_v24  ;;  %v4056_v34 = vshrl.u32 %v961_v33, 7  ;;  %v4062_v36 = vld [vmem:[%s3965_s26] sm:$0x7]  ;;  %s4512_s8 = sld [smem:[#allocation10_spill]]  ;;  %s4518_s21 = sld [smem:[#allocation4_spill]] }
  0x4d   : > { %1109 = vmatpush1.bf16.msra.mxu0 %v3526_v9 }
  0x4e   : > { %1110 = vmatprep.subr.bf16.mxu0 %v3527_v10  ;;  %v4059_v35 = vsub.s32 0, %v4056_v34  ;;  %v4065_v37 = vsub.s32 1, %v4056_v34 }
  0x4f   : > { %3391 = vmatpush3.bf16.msra.mxu1 %v3559_v25  ;;  %v4053_v32 = vld [vmem:[%s4511_s24] sm:$0xff]   ;;  %v4079_v51 = vld [vmem:[%s4511_s24 + $0x48] sm:$0xff]   ;;  %v4090_v56 = vld [vmem:[%s4511_s24 + $0x50] sm:$0xff]  }
  0x50   : > { %3392 = vmatprep.subr.bf16.mxu1 %v3779_v24  ;;  %v964_v38 = vrot.slane %v4062_v36, %v4059_v35  ;;  %v968_v40 = vrot.slane %v4062_v36, %v4065_v37  ;;  %v4074_v48 = vld [vmem:[%s4511_s24 + $0x40] sm:$0xff]   ;;  %v3545_v55 = vld [vmem:[%s4511_s24 + $0x8] sm:$0xff]   ;;  %v3547_v59 = vld [vmem:[%s4511_s24 + $0x10] sm:$0xff]  }
  0x51   : > { %1111 = vmatpush1.bf16.msra.mxu0 %v3529_v11  ;;  %v4099_v60 = vld [vmem:[%s4511_s24 + $0x58] sm:$0xff]   ;;  %v4108_v0 = vld [vmem:[%s4511_s24 + $0x60] sm:$0xff]   ;;  %v4117_v4 = vld [vmem:[%s4511_s24 + $0x68] sm:$0xff]  }
  0x52   : > { %1112 = vmatprep.subr.bf16.mxu0 %v3530_v12  ;;  %v3549_v63 = vld [vmem:[%s4511_s24 + $0x18] sm:$0xff]   ;;  %v3551_v3 = vld [vmem:[%s4511_s24 + $0x20] sm:$0xff]   ;;  %v3553_v8 = vld [vmem:[%s4511_s24 + $0x28] sm:$0xff]   ;;  %p3245_p8 = scmp.ne.s32.totalorder %s4518_s21, 5 }
  0x53   : > { %3393 = vmatpush3.bf16.msra.mxu1 %v3560_v26  ;;  %v4126_v9 = vld [vmem:[%s4511_s24 + $0x70] sm:$0xff]   ;;  %s4519_s2 = sld [smem:[#allocation25_spill]] (!%p3245_p8)  ;;  %vm3782_vm1 = vmmov (!%p3245_p8), 0   ;;  %s4520_s25 = sld [smem:[#allocation27_spill]] (!%p3245_p8) }
  0x54   : > { %3394 = vmatprep.subr.bf16.mxu1 %v3779_v24  ;;  %v3555_v12 = vld [vmem:[%s4511_s24 + $0x30] sm:$0xff]   ;;  %s4521_s10 = sld [smem:[#allocation23_spill]] (!%p3245_p8)  ;;  %s4522_s0 = sld [smem:[#allocation24_spill]] (!%p3245_p8) }
  0x55   : > { %1113 = vmatpush1.bf16.msra.mxu0 %v3532_v13  ;;  %v4135_v13 = vld [vmem:[%s4511_s24 + $0x78] sm:$0xff]  }
  0x56   : > { %1114 = vmatprep.subr.bf16.mxu0 %v3533_v14 }
  0x57   : > { %3395 = vmatpush3.bf16.msra.mxu1 %v3561_v27 }
  0x58   : > { %3396 = vmatprep.subr.bf16.mxu1 %v3779_v24 }
  0x59   : > { %1115 = vmatpush1.bf16.msra.mxu0 %v3535_v15 }
  0x5a   : > { %1116 = vmatprep.subr.bf16.mxu0 %v3536_v16  ;;  %v3557_v16 = vld [vmem:[%s4511_s24 + $0x38] sm:$0xff]  }
  0x5b   : > { %3397 = vmatpush3.bf16.msra.mxu1 %v3562_v28 }
  0x5c   : > { %3398 = vmatprep.subr.bf16.mxu1 %v3779_v24 }
  0x5d   : > { %1117 = vmatpush1.bf16.msra.mxu0 %v3538_v17 }
  0x5e   : > { %1118 = vmatprep.subr.bf16.mxu0 %v3539_v18  ;;  %v971_v18 = vsub.s32 2, %v4056_v34 }
  0x5f   : > { %3399 = vmatpush3.bf16.msra.mxu1 %v3563_v29 }
  0x60   : > { %3400 = vmatprep.subr.bf16.mxu1 %v3779_v24 }
  0x61   : > { %1119 = vmatpush1.bf16.msra.mxu0 %v3541_v19  ;;  %v972_v19 = vrot.slane %v4062_v36, %v971_v18 }
  0x63   : > { %3401 = vmatpush3.bf16.msra.mxu1 %v3564_v30 }
  0x64   : > { %1137 = vmatmul.mubr.bf16.vlgmr.msra.gmra.mrb[0].mxu0 %v958_v22  ;;  %3402 = vmatprep.subr.bf16.mxu1 %v3779_v24 }
  0x67   : > { %3403 = vmatpush3.bf16.msra.mxu1 %v3565_v31 }
  0x68   : > { %1393 = vmatprep.subr.bf16.mxu1 %v4053_v32 }
  0x6a   : > { %3405 = vmatmul.mubr.bf16.vlgmr.msra.gmra.mrb[0].mxu1 %v958_v22 }
 0x137   : > { %v1138_v39 = vpop.f32.mrb[0].mxu0 }
 0x138   : > { %v1140_v41 = vpop.f32.mrb[1].mxu0  ;;  %v1139_v43 = vadd.f32 %v1138_v39, %v964_v38 }
 0x139   : > { %v1142_v42 = vpop.f32.mrb[2].mxu0  ;;  %v1141_v46 = vadd.f32 %v1140_v41, %v968_v40 }
 0x13a   : > { %v1143_v44 = vadd.f32 %v1142_v42, %v964_v38  ;;  %v1144_v45 = vpop.f32.mrb[3].mxu0 }
 0x13b   : > { %v1145_v47 = vadd.f32 %v1144_v45, %v968_v40 }
 0x13c   : > { %v1188_v49 = vpack.c.bf16 %v1143_v44, %v1139_v43 }
 0x13d   : > { %v1189_v50 = vpack.c.bf16 %v1145_v47, %v1141_v46  ;;  %v1181_v22 = vpop.f32.mrb[0].mxu1 }
 0x13e   : > { %3293 = vmatprep.mubr.bf16.mxu0 %v1188_v49  ;;  %v1182_v23 = vadd.f32 %v1181_v22, %v972_v19  ;;  %v3406_v25 = vpop.f32.mrb[1].mxu1  ;;  %v3570_v22 = vld [vmem:[%s3951_s19 + $0x20] sm:$0xff]  }
 0x13f   : > { %v1295_v52 = vmul.bf16 %v4074_v48, %v1189_v50  ;;  %v1287_v53 = vmul.bf16 %v4053_v32, %v1189_v50  ;;  %v1296_v54 = vmul.bf16 %v4079_v51, %v1189_v50  ;;  %v1288_v57 = vmul.bf16 %v3545_v55, %v1189_v50  ;;  %v1184_v26 = vpop.f32.mrb[2].mxu1  ;;  %v3572_v25 = vld [vmem:[%s3951_s19 + $0x30] sm:$0xff]  }
 0x140   : > { %v1297_v58 = vmul.bf16 %v4090_v56, %v1189_v50  ;;  %v1289_v61 = vmul.bf16 %v3547_v59, %v1189_v50  ;;  %v1298_v62 = vmul.bf16 %v4099_v60, %v1189_v50  ;;  %v1290_v1 = vmul.bf16 %v3549_v63, %v1189_v50  ;;  %v3407_v28 = vpop.f32.mrb[3].mxu1 }
 0x141   : > { %3277 = vmatprep.subr.bf16.mxu0 %v1295_v52  ;;  %v1299_v2 = vmul.bf16 %v4108_v0, %v1189_v50  ;;  %v1291_v6 = vmul.bf16 %v3551_v3, %v1189_v50  ;;  %v1300_v7 = vmul.bf16 %v4117_v4, %v1189_v50  ;;  %v1292_v10 = vmul.bf16 %v3553_v8, %v1189_v50 }
 0x142   : > { %3278 = vmatpush3.bf16.xpose.msra.mxu0 %v1287_v53  ;;  %v1301_v11 = vmul.bf16 %v4126_v9, %v1189_v50  ;;  %v1293_v14 = vmul.bf16 %v3555_v12, %v1189_v50  ;;  %v1302_v15 = vmul.bf16 %v4135_v13, %v1189_v50  ;;  %v1294_v17 = vmul.bf16 %v3557_v16, %v1189_v50 }
 0x143   : > { %3279 = vmatprep.subr.bf16.mxu0 %v1296_v54  ;;  %v1185_v27 = vadd.f32 %v1184_v26, %v972_v19  ;;  %v3569_v19 = vld [vmem:[%s3951_s19 + $0x18] sm:$0xff]  }
 0x144   : > { %v3573_v26 = vld [vmem:[%s3951_s19 + $0x38] sm:$0xff]  }
 0x145   : > { %v1190_v29 = vpack.c.bf16 %v1185_v27, %v1182_v23  ;;  %v3571_v23 = vld [vmem:[%s3951_s19 + $0x28] sm:$0xff]  }
 0x147   : > { %v1303_v30 = vmul.bf16 %v4053_v32, %v1190_v29  ;;  %v1304_v31 = vmul.bf16 %v3545_v55, %v1190_v29  ;;  %v1305_v33 = vmul.bf16 %v3547_v59, %v1190_v29  ;;  %v1306_v38 = vmul.bf16 %v3549_v63, %v1190_v29 }
 0x148   : > { %v1307_v36 = vmul.bf16 %v3551_v3, %v1190_v29  ;;  %v1308_v39 = vmul.bf16 %v3553_v8, %v1190_v29  ;;  %v1309_v40 = vmul.bf16 %v3555_v12, %v1190_v29  ;;  %v1310_v32 = vmul.bf16 %v3557_v16, %v1190_v29 }
 0x149   : > { %1394 = vmatpush1.bf16.msra.mxu1 %v1303_v30  ;;  %v1311_v41 = vmul.bf16 %v4074_v48, %v1190_v29  ;;  %v1312_v42 = vmul.bf16 %v4079_v51, %v1190_v29  ;;  %v1313_v43 = vmul.bf16 %v4090_v56, %v1190_v29  ;;  %v1314_v44 = vmul.bf16 %v4099_v60, %v1190_v29 }
 0x14a   : > { %3280 = vmatpush3.bf16.xpose.msra.mxu0 %v1288_v57  ;;  %1395 = vmatprep.subr.bf16.mxu1 %v3545_v55  ;;  %v1315_v45 = vmul.bf16 %v4108_v0, %v1190_v29  ;;  %v1316_v46 = vmul.bf16 %v4117_v4, %v1190_v29  ;;  %v1317_v47 = vmul.bf16 %v4126_v9, %v1190_v29 }
 0x14b   : > { %3281 = vmatprep.subr.bf16.mxu0 %v1297_v58 }
 0x14d   : > { %1396 = vmatpush1.bf16.msra.mxu1 %v1304_v31 }
 0x14e   : > { %1397 = vmatprep.subr.bf16.mxu1 %v3547_v59 }
 0x151   : > { %1398 = vmatpush1.bf16.msra.mxu1 %v1305_v33 }
 0x152   : > { %3282 = vmatpush3.bf16.xpose.msra.mxu0 %v1289_v61  ;;  %1399 = vmatprep.subr.bf16.mxu1 %v3549_v63  ;;  %v3567_v63 = vld [vmem:[%s3951_s19 + $0x8] sm:$0xff]  }
 0x153   : > { %3283 = vmatprep.subr.bf16.mxu0 %v1298_v62  ;;  %v3566_v62 = vld [vmem:[%s3951_s19] sm:$0xff]  }
 0x155   : > { %1400 = vmatpush1.bf16.msra.mxu1 %v1306_v38 }
 0x156   : > { %1401 = vmatprep.subr.bf16.mxu1 %v3551_v3 }
 0x159   : > { %1402 = vmatpush1.bf16.msra.mxu1 %v1307_v36 }
 0x15a   : > { %3284 = vmatpush3.bf16.xpose.msra.mxu0 %v1290_v1  ;;  %1403 = vmatprep.subr.bf16.mxu1 %v3553_v8 }
 0x15b   : > { %3285 = vmatprep.subr.bf16.mxu0 %v1299_v2 }
 0x15d   : > { %1404 = vmatpush1.bf16.msra.mxu1 %v1308_v39 }
 0x15e   : > { %1405 = vmatprep.subr.bf16.mxu1 %v3555_v12 }
 0x161   : > { %1406 = vmatpush1.bf16.msra.mxu1 %v1309_v40 }
 0x162   : > { %3286 = vmatpush3.bf16.xpose.msra.mxu0 %v1291_v6  ;;  %1407 = vmatprep.subr.bf16.mxu1 %v3557_v16 }
 0x163   : > { %3287 = vmatprep.subr.bf16.mxu0 %v1300_v7 }
 0x165   : > { %1408 = vmatpush1.bf16.msra.mxu1 %v1310_v32 }
 0x166   : > { %1409 = vmatprep.subr.bf16.mxu1 %v4074_v48  ;;  %v1318_v48 = vmul.bf16 %v4135_v13, %v1190_v29 }
 0x169   : > { %1410 = vmatpush1.bf16.msra.mxu1 %v1311_v41 }
 0x16a   : > { %3288 = vmatpush3.bf16.xpose.msra.mxu0 %v1292_v10  ;;  %1411 = vmatprep.subr.bf16.mxu1 %v4079_v51 }
 0x16b   : > { %3289 = vmatprep.subr.bf16.mxu0 %v1301_v11 }
 0x16d   : > { %1412 = vmatpush1.bf16.msra.mxu1 %v1312_v42 }
 0x16e   : > { %1413 = vmatprep.subr.bf16.mxu1 %v4090_v56 }
 0x171   : > { %1414 = vmatpush1.bf16.msra.mxu1 %v1313_v43 }
 0x172   : > { %3290 = vmatpush3.bf16.xpose.msra.mxu0 %v1293_v14  ;;  %1415 = vmatprep.subr.bf16.mxu1 %v4099_v60 }
 0x173   : > { %3291 = vmatprep.subr.bf16.mxu0 %v1302_v15 }
 0x175   : > { %1416 = vmatpush1.bf16.msra.mxu1 %v1314_v44 }
 0x176   : > { %1417 = vmatprep.subr.bf16.mxu1 %v4108_v0  ;;  %v3568_v0 = vld [vmem:[%s3951_s19 + $0x10] sm:$0xff]  }
 0x179   : > { %1418 = vmatpush1.bf16.msra.mxu1 %v1315_v45 }
 0x17a   : > { %3292 = vmatpush3.bf16.xpose.msra.mxu0 %v1294_v17  ;;  %1419 = vmatprep.subr.bf16.mxu1 %v4117_v4 }
 0x17b   : > { %3408 = vmatprep.subr.bf16.mxu0 %v3779_v24 }
 0x17d   : > { %1420 = vmatpush1.bf16.msra.mxu1 %v1316_v46 }
 0x17e   : > { %1421 = vmatprep.subr.bf16.mxu1 %v4126_v9 }
 0x181   : > { %3294 = vmatmul.mubr.bf16.vlgmr.msra.gmra.mrb[4].mxu0 %v1188_v49  ;;  %1422 = vmatpush1.bf16.msra.mxu1 %v1317_v47  ;;  %v893_v49 = vld [vmem:[%s4512_s8] sm:$0x3] }
 0x182   : > { %3424 = vmatprep.mubr.msk.bf16.mxu0 %vm3780_vm0, %v3779_v24  ;;  %1423 = vmatprep.subr.bf16.mxu1 %v4135_v13  ;;  %v1323_v50 = vrot.slane %v893_v49, %v4059_v35  ;;  %v1327_v51 = vrot.slane %v893_v49, %v4065_v37  ;;  %v3574_v49 = vld [vmem:[%s3976_s28] ss:$24 sps:$4 sm:$0xff]  }
 0x183   : > { %3409 = vmatpush3.bf16.msra.mxu0 %v3566_v62 }
 0x184   : > { %3410 = vmatprep.subr.bf16.mxu0 %v3779_v24 }
 0x185   : > { %1424 = vmatpush1.bf16.msra.mxu1 %v1318_v48 }
 0x187   : > { %3411 = vmatpush3.bf16.msra.mxu0 %v3567_v63  ;;  %v3588_v63 = vld [vmem:[%s3976_s28 + $0x64] ss:$24 sps:$4 sm:$0xff]  }
 0x188   : > { %3412 = vmatprep.subr.bf16.mxu0 %v3779_v24 }
 0x18b   : > { %3413 = vmatpush3.bf16.msra.mxu0 %v3568_v0  ;;  %v3586_v0 = vld [vmem:[%s3976_s28 + $0x60] ss:$24 sps:$4 sm:$0xff]  }
 0x18c   : > { %3414 = vmatprep.subr.bf16.mxu0 %v3779_v24 }
 0x18f   : > { %3415 = vmatpush3.bf16.msra.mxu0 %v3569_v19  ;;  %v3613_v19 = vld [vmem:[%s3976_s28 + $0x128] ss:$24 sps:$4 sm:$0xff]  }
 0x190   : > { %3416 = vmatprep.subr.bf16.mxu0 %v3779_v24 }
 0x193   : > { %3417 = vmatpush3.bf16.msra.mxu0 %v3570_v22  ;;  %v3615_v22 = vld [vmem:[%s3976_s28 + $0x12c] ss:$24 sps:$4 sm:$0xff]  }
 0x194   : > { %3418 = vmatprep.subr.bf16.mxu0 %v3779_v24 }
 0x197   : > { %3419 = vmatpush3.bf16.msra.mxu0 %v3571_v23  ;;  %v3618_v23 = vld [vmem:[%s3976_s28 + $0x154] ss:$24 sps:$4 sm:$0xff]  }
 0x198   : > { %3420 = vmatprep.subr.bf16.mxu0 %v3779_v24 }
 0x19b   : > { %3421 = vmatpush3.bf16.msra.mxu0 %v3572_v25  ;;  %v3616_v25 = vld [vmem:[%s3976_s28 + $0x150] ss:$24 sps:$4 sm:$0xff]  }
 0x19c   : > { %3422 = vmatprep.subr.bf16.mxu0 %v3779_v24  ;;  %v3135_v24 = vld [vmem:[%s4513_s1] ss:$0 sm:$0xff] }
 0x19f   : > { %3423 = vmatpush3.bf16.msra.mxu0 %v3573_v26  ;;  %v3621_v26 = vld [vmem:[%s3976_s28 + $0x15c] ss:$24 sps:$4 sm:$0xff]  }
 0x254   : > { %v1364_v52 = vpop.f32.mrb[4].mxu0 }
 0x255   : > { %v1365_v53 = vadd.f32 %v1364_v52, %v1323_v50  ;;  %v1366_v54 = vpop.f32.mrb[5].mxu0  ;;  %v3579_v52 = vld [vmem:[%s3976_s28 + $0xc] ss:$24 sps:$4 sm:$0xff]  }
 0x256   : > { %v1367_v55 = vadd.f32 %v1366_v54, %v1327_v51  ;;  %v1368_v56 = vpop.f32.mrb[6].mxu0  ;;  %v3585_v54 = vld [vmem:[%s3976_s28 + $0x3c] ss:$24 sps:$4 sm:$0xff]   ;;  %1962 = vmatprep.subr.bf16.mxu0 %v3579_v52  ;;  %v3650_v52 = vld [vmem:[%s3981_s30 + $0x48] sm:$0xff]  }
 0x257   : > { %v1370_v57 = vpop.f32.mrb[7].mxu0  ;;  %v1369_v58 = vadd.f32 %v1368_v56, %v1323_v50  ;;  %v3576_v50 = vld [vmem:[%s3976_s28 + $0x4] ss:$24 sps:$4 sm:$0xff]  }
 0x258   : > { %v1371_v59 = vadd.f32 %v1370_v57, %v1327_v51  ;;  %v1373_v60 = vmax.f32 %v1365_v53, %v1367_v55  ;;  %v3577_v51 = vld [vmem:[%s3976_s28 + $0x8] ss:$24 sps:$4 sm:$0xff]   ;;  %1919 = vmatprep.subr.bf16.mxu1 %v3576_v50  ;;  %v3627_v50 = vld [vmem:[%s3976_s28 + $0x44] ss:$24 sps:$4 sm:$0xff]  }
 0x25a   : > { %1374 = vmax.xlane.f32.xlu0 %v1373_v60  ;;  %v1376_v61 = vmax.f32 %v1369_v58, %v1371_v59 }
 0x25e   : > { %1377 = vmax.xlane.f32.xlu0 %v1376_v61 }
 0x2e7   : > { %v1375_v1 = vpop.xlane.xlu0 %1374 }
 0x2e8   : > { %v1379_v2 = vsub.f32 %v1365_v53, %v1375_v1  ;;  %v1380_v3 = vsub.f32 %v1367_v55, %v1375_v1  ;;  %v3582_v53 = vld [vmem:[%s3976_s28 + $0x34] ss:$24 sps:$4 sm:$0xff]   ;;  %v3580_v55 = vld [vmem:[%s3976_s28 + $0x30] ss:$24 sps:$4 sm:$0xff]  }
 0x2e9   : > { %v3591_v1 = vld [vmem:[%s3976_s28 + $0x6c] ss:$24 sps:$4 sm:$0xff]  }
 0x2ea   : > { %v1383_v4 = vmul.f32 1.442695, %v1379_v2  ;;  %v1385_v6 = vmul.f32 1.442695, %v1380_v3  ;;  %v3589_v2 = vld [vmem:[%s3976_s28 + $0x68] ss:$24 sps:$4 sm:$0xff]  }
 0x2eb   : > { %v1378_v7 = vpop.xlane.xlu0 %1377  ;;  %v3594_v3 = vld [vmem:[%s3976_s28 + $0x94] ss:$24 sps:$4 sm:$0xff]  }
 0x2ec   : > { %v1381_v8 = vsub.f32 %v1369_v58, %v1378_v7  ;;  %v1382_v9 = vsub.f32 %v1371_v59, %v1378_v7  ;;  %3694 = vpow2.f32 %v1383_v4  ;;  %v3592_v4 = vld [vmem:[%s3976_s28 + $0x90] ss:$24 sps:$4 sm:$0xff]  }
 0x2ed   : > { %3696 = vpow2.f32 %v1385_v6  ;;  %v3597_v6 = vld [vmem:[%s3976_s28 + $0x9c] ss:$24 sps:$4 sm:$0xff]   ;;  %v3595_v7 = vld [vmem:[%s3976_s28 + $0x98] ss:$24 sps:$4 sm:$0xff]  }
 0x2ee   : > { %v1387_v10 = vmul.f32 1.442695, %v1381_v8  ;;  %v1389_v11 = vmul.f32 1.442695, %v1382_v9  ;;  %v3600_v8 = vld [vmem:[%s3976_s28 + $0xc4] ss:$24 sps:$4 sm:$0xff]  }
 0x2ef   : > { %v3598_v9 = vld [vmem:[%s3976_s28 + $0xc0] ss:$24 sps:$4 sm:$0xff]  }
 0x2f0   : > { %3698 = vpow2.f32 %v1387_v10  ;;  %v3603_v10 = vld [vmem:[%s3976_s28 + $0xcc] ss:$24 sps:$4 sm:$0xff]  }
 0x2f1   : > { %3700 = vpow2.f32 %v1389_v11  ;;  %v3601_v11 = vld [vmem:[%s3976_s28 + $0xc8] ss:$24 sps:$4 sm:$0xff]  }
 0x2f6   : > { %v3695_v12 = vpop.eup %3694 }
 0x2f7   : > { %v3697_v13 = vpop.eup %3696 }
 0x2fa   : > { %v3699_v14 = vpop.eup %3698 }
 0x2fb   : > { %v3701_v15 = vpop.eup %3700  ;;  %v1391_v16 = vpack.c.bf16 %v3699_v14, %v3695_v12  ;;  %v3606_v12 = vld [vmem:[%s3976_s28 + $0xf4] ss:$24 sps:$4 sm:$0xff]  }
 0x2fc   : > { %v1392_v17 = vpack.c.bf16 %v3701_v15, %v3697_v13  ;;  %v3604_v13 = vld [vmem:[%s3976_s28 + $0xf0] ss:$24 sps:$4 sm:$0xff]   ;;  %v3609_v14 = vld [vmem:[%s3976_s28 + $0xfc] ss:$24 sps:$4 sm:$0xff]  }
 0x2fd   : > { %v3607_v15 = vld [vmem:[%s3976_s28 + $0xf8] ss:$24 sps:$4 sm:$0xff]  }
 0x2fe   : > { %1425 = vmatprep.mubr.bf16.mxu1 %v1392_v17  ;;  %v3610_v17 = vld [vmem:[%s3976_s28 + $0x120] ss:$24 sps:$4 sm:$0xff]  }
 0x2ff   : > { %1426 = vmatmul.mubr.bf16.vlgmr.msra.gmra.mrb[4].mxu1 %v1391_v16  ;;  %v3612_v16 = vld [vmem:[%s3976_s28 + $0x124] ss:$24 sps:$4 sm:$0xff]  }
 0x300   : > { %1951 = vmatprep.mubr.bf16.mxu1 %v3778_v5  ;;  %1920 = vmatpush1.bf16.msra.mxu1 %v3574_v49 }
 0x301   : > { %1921 = vmatprep.subr.bf16.mxu1 %v3582_v53  ;;  %v3625_v53 = vld [vmem:[%s3976_s28 + $0x40] ss:$24 sps:$4 sm:$0xff]  }
 0x304   : > { %1922 = vmatpush1.bf16.msra.mxu1 %v3580_v55  ;;  %v3651_v55 = vld [vmem:[%s3981_s30 + $0x8] sm:$0xff]  }
 0x305   : > { %1923 = vmatprep.subr.bf16.mxu1 %v3588_v63  ;;  %v3639_v63 = vld [vmem:[%s3976_s28 + $0x104] ss:$24 sps:$4 sm:$0xff]  }
 0x308   : > { %1924 = vmatpush1.bf16.msra.mxu1 %v3586_v0  ;;  %v3663_v0 = vld [vmem:[%s3981_s30 + $0x20] sm:$0xff]  }
 0x309   : > { %1925 = vmatprep.subr.bf16.mxu1 %v3594_v3  ;;  %v3642_v3 = vld [vmem:[%s3976_s28 + $0x134] ss:$24 sps:$4 sm:$0xff]  }
 0x30c   : > { %1926 = vmatpush1.bf16.msra.mxu1 %v3592_v4  ;;  %v3667_v4 = vld [vmem:[%s3981_s30 + $0x28] sm:$0xff]  }
 0x30d   : > { %1927 = vmatprep.subr.bf16.mxu1 %v3600_v8  ;;  %v3643_v8 = vld [vmem:[%s3976_s28 + $0x160] ss:$24 sps:$4 sm:$0xff]  }
 0x310   : > { %1928 = vmatpush1.bf16.msra.mxu1 %v3598_v9  ;;  %v3648_v9 = vld [vmem:[%s3981_s30 + $0xc0] sm:$0xff]  }
 0x311   : > { %1929 = vmatprep.subr.bf16.mxu1 %v3606_v12  ;;  %v3653_v12 = vld [vmem:[%s3981_s30 + $0x88] sm:$0xff]  }
 0x314   : > { %1930 = vmatpush1.bf16.msra.mxu1 %v3604_v13  ;;  %v3656_v13 = vld [vmem:[%s3981_s30 + $0xd0] sm:$0xff]  }
 0x315   : > { %1931 = vmatprep.subr.bf16.mxu1 %v3612_v16  ;;  %v3661_v16 = vld [vmem:[%s3981_s30 + $0x98] sm:$0xff]  }
 0x318   : > { %1932 = vmatpush1.bf16.msra.mxu1 %v3610_v17  ;;  %v3664_v17 = vld [vmem:[%s3981_s30 + $0xe0] sm:$0xff]  }
 0x319   : > { %1933 = vmatprep.subr.bf16.mxu1 %v3618_v23  ;;  %v3669_v23 = vld [vmem:[%s3981_s30 + $0xa8] sm:$0xff]  }
 0x31c   : > { %1934 = vmatpush1.bf16.msra.mxu1 %v3616_v25  ;;  %v3670_v25 = vld [vmem:[%s3981_s30 + $0x70] sm:$0xff]  }
 0x3d2   : > { %v1427_v27 = vpop.f32.mrb[4].mxu1 }
 0x3d3   : > { %v1429_v28 = vpop.f32.mrb[5].mxu1 }
 0x3d4   : > { %v1436_v29 = vmax.f32 %v1429_v28, 1e-30  ;;  %v1431_v30 = vpop.f32.mrb[6].mxu1  ;;  %v3624_v28 = vld [vmem:[%s3976_s28 + $0x14] ss:$24 sps:$4 sm:$0xff]  }
 0x3d5   : > { %v1433_v31 = vpop.f32.mrb[7].mxu1  ;;  %2005 = vmatprep.subr.bf16.mxu1 %v3624_v28  ;;  %v3673_v28 = vld [vmem:[%s3981_s30 + $0xb0] sm:$0xff]  }
 0x3d6   : > { %3702 = vrcp.f32 %v1436_v29  ;;  %v1437_v33 = vmax.f32 %v1433_v31, 1e-30  ;;  %v3646_v29 = vld [vmem:[%s3981_s30 + $0x40] sm:$0xff]  }
 0x3d8   : > { %3704 = vrcp.f32 %v1437_v33 }
 0x3e0   : > { %v3703_v38 = vpop.eup %3702 }
 0x3e1   : > { %v1440_v36 = vmul.f32 %v3703_v38, %v1427_v27  ;;  %v3619_v27 = vld [vmem:[%s3976_s28 + $0x158] ss:$24 sps:$4 sm:$0xff]  }
 0x3e2   : > { %v3705_v39 = vpop.eup %3704 }
 0x3e3   : > { %v1441_v40 = vmul.f32 %v3705_v39, %v1431_v30 }
 0x3e5   : > { %v1458_v32 = vpack.c.bf16 %v1441_v40, %v1440_v36 }
 0x3e7   : > { %3425 = vmatmul.mubr.bf16.vlgmr.msra.gmra.mrb[8].mxu0 %v1458_v32 }
 0x3e8   : > { %1994 = vmatprep.mubr.bf16.mxu0 %v3778_v5  ;;  %1963 = vmatpush1.bf16.msra.mxu0 %v3577_v51  ;;  %v3647_v51 = vld [vmem:[%s3981_s30] sm:$0xff]  }
 0x3e9   : > { %1964 = vmatprep.subr.bf16.mxu0 %v3585_v54  ;;  %v3630_v54 = vld [vmem:[%s3976_s28 + $0x74] ss:$24 sps:$4 sm:$0xff]  }
 0x4ba   : > { %v1548_v41 = vpop.f32.mrb[8].mxu0 }
 0x4bb   : > { %v1549_v42 = vadd.f32 %v3135_v24, %v1548_v41  ;;  %v3426_v43 = vpop.f32.mrb[9].mxu0 }
 0x4bc   : > { %v1551_v44 = vpop.f32.mrb[10].mxu0 }
 0x4bd   : > { %v1552_v45 = vadd.f32 %v3135_v24, %v1551_v44  ;;  %v3427_v46 = vpop.f32.mrb[11].mxu0  ;;  %v1555_v47 = vadd.f32 %v1549_v42, %v4026_v20  ;;  %v3583_v20 = vld [vmem:[%s3976_s28 + $0x38] ss:$24 sps:$4 sm:$0xff]   ;;  %v3144_v24 = vld [vmem:[%s869_s13] ss:$0 sm:$0xff]  ;;  %s4514_s13 = sld [smem:[#allocation20_spill]] }
 0x4be   : > { %1965 = vmatpush1.bf16.msra.mxu0 %v3583_v20  ;;  %v3145_v44 = vld [vmem:[%s872_s18] ss:$0 sm:$0xff]  ;;  %v3654_v20 = vld [vmem:[%s3981_s30 + $0x50] sm:$0xff]  }
 0x4bf   : > { %1559 = vadd.xlane.f32.xlu1 %v1555_v47  ;;  %v1556_v48 = vadd.f32 %v1552_v45, %v4028_v21  ;;  %1966 = vmatprep.subr.bf16.mxu0 %v3591_v1  ;;  %v3666_v1 = vld [vmem:[%s3981_s30 + $0x68] sm:$0xff]  }
 0x4c2   : > { %1967 = vmatpush1.bf16.msra.mxu0 %v3589_v2  ;;  %v3637_v2 = vld [vmem:[%s3976_s28 + $0x100] ss:$24 sps:$4 sm:$0xff]  }
 0x4c3   : > { %1561 = vadd.xlane.f32.xlu1 %v1556_v48  ;;  %1968 = vmatprep.subr.bf16.mxu0 %v3597_v6  ;;  %v3640_v6 = vld [vmem:[%s3976_s28 + $0x130] ss:$24 sps:$4 sm:$0xff]   ;;  %s4515_s18 = scalar_lea.vmem %s4514_s13, %s3933_s4 }
 0x4c6   : > { %1969 = vmatpush1.bf16.msra.mxu0 %v3595_v7  ;;  %v3645_v7 = vld [vmem:[%s3976_s28 + $0x164] ss:$24 sps:$4 sm:$0xff]  }
 0x4c7   : > { %1970 = vmatprep.subr.bf16.mxu0 %v3603_v10  ;;  %v3649_v10 = vld [vmem:[%s3981_s30 + $0x80] sm:$0xff]  }
 0x4ca   : > { %1971 = vmatpush1.bf16.msra.mxu0 %v3601_v11  ;;  %v3652_v11 = vld [vmem:[%s3981_s30 + $0xc8] sm:$0xff]  }
 0x4cb   : > { %1972 = vmatprep.subr.bf16.mxu0 %v3609_v14  ;;  %v3657_v14 = vld [vmem:[%s3981_s30 + $0x90] sm:$0xff]  }
 0x4ce   : > { %1973 = vmatpush1.bf16.msra.mxu0 %v3607_v15  ;;  %v3660_v15 = vld [vmem:[%s3981_s30 + $0xd8] sm:$0xff]  }
 0x4cf   : > { %1974 = vmatprep.subr.bf16.mxu0 %v3615_v22  ;;  %v3668_v22 = vld [vmem:[%s3981_s30 + $0xe8] sm:$0xff]  }
 0x4d2   : > { %1975 = vmatpush1.bf16.msra.mxu0 %v3613_v19  ;;  %v3665_v19 = vld [vmem:[%s3981_s30 + $0xa0] sm:$0xff]  }
 0x4d3   : > { %1976 = vmatprep.subr.bf16.mxu0 %v3621_v26  ;;  %v3671_v26 = vld [vmem:[%s3981_s30 + $0x30] sm:$0xff]  }
 0x4d6   : > { %1977 = vmatpush1.bf16.msra.mxu0 %v3619_v27  ;;  %v3672_v27 = vld [vmem:[%s3981_s30 + $0xf0] sm:$0xff]  }
 0x4d7   : > { %3304 = vmatprep.subr.bf16.mxu0 %v3646_v29  ;;  %v3674_v29 = vld [vmem:[%s3981_s30 + $0x78] sm:$0xff]  }
 0x54c   : > { %v1560_v21 = vpop.xlane.xlu1 %1559 }
 0x54d   : > { %v1564_v56 = vmul.f32 0.0078125, %v1560_v21  ;;  %v3628_v21 = vld [vmem:[%s3976_s28 + $0x70] ss:$24 sps:$4 sm:$0xff]  }
 0x54f   : > { %v4200_v57 = vsub.f32 %v1555_v47, %v1564_v56  ;;  %v3633_v56 = vld [vmem:[%s3976_s28 + $0xa4] ss:$24 sps:$4 sm:$0xff]  }
 0x550   : > { %v1562_v58 = vpop.xlane.xlu1 %1561 }
 0x551   : > { %v1565_v59 = vmul.f32 0.0078125, %v1562_v58  ;;  %v1568_v60 = vmul.f32 %v4200_v57, %v4200_v57  ;;  %v3631_v58 = vld [vmem:[%s3976_s28 + $0xa0] ss:$24 sps:$4 sm:$0xff]  }
 0x553   : > { %v4204_v61 = vsub.f32 %v1556_v48, %v1565_v59  ;;  %1570 = vadd.xlane.f32.xlu0 %v1568_v60  ;;  %v3622_v48 = vld [vmem:[%s3976_s28 + $0x10] ss:$24 sps:$4 sm:$0xff]   ;;  %v3636_v59 = vld [vmem:[%s3976_s28 + $0xd4] ss:$24 sps:$4 sm:$0xff]   ;;  %v3659_v60 = vld [vmem:[%s3981_s30 + $0x18] sm:$0xff]  }
 0x555   : > { %v1569_v62 = vmul.f32 %v4204_v61, %v4204_v61 }
 0x557   : > { %1572 = vadd.xlane.f32.xlu1 %v1569_v62  ;;  %v3634_v62 = vld [vmem:[%s3976_s28 + $0xd0] ss:$24 sps:$4 sm:$0xff]  }
 0x5e0   : > { %v1571_v30 = vpop.xlane.xlu0 %1570 }
 0x5e1   : > { %v1574_v31 = vmul.f32 0.0078125, %v1571_v30  ;;  %v3675_v30 = vld [vmem:[%s3981_s30 + $0x38] sm:$0xff]  }
 0x5e3   : > { %v1576_v33 = vadd.f32 1e-05, %v1574_v31  ;;  %v3676_v31 = vld [vmem:[%s3981_s30 + $0xf8] sm:$0xff]  }
 0x5e4   : > { %v1573_v38 = vpop.xlane.xlu1 %1572 }
 0x5e5   : > { %3706 = vrsqrt.f32 %v1576_v33  ;;  %v1575_v36 = vmul.f32 0.0078125, %v1573_v38  ;;  %v3677_v33 = vld [vmem:[%s3981_s30 + $0xb8] sm:$0xff]   ;;  %v3678_v38 = vld [vmem:[%s3981_s30 + $0x140] sm:$0xff]  }
 0x5e7   : > { %v1577_v39 = vadd.f32 1e-05, %v1575_v36  ;;  %v4301_v36 = vld [vmem:[%s3986_s29] sm:$0x3f] }
 0x5e9   : > { %3708 = vrsqrt.f32 %v1577_v39  ;;  %v1663_v39 = vsub.s32 3, %v4056_v34 }
 0x5ef   : > { %v3707_v40 = vpop.eup %3706 }
 0x5f0   : > { %v1580_v32 = vmul.f32 %v3707_v40, %v4200_v57  ;;  %v3655_v57 = vld [vmem:[%s3981_s30 + $0x10] sm:$0xff]   ;;  %v1652_v40 = vrot.slane %v4301_v36, %v4059_v35 }
 0x5f2   : > { %v1588_v43 = vmul.f32 %v3144_v24, %v1580_v32  ;;  %v1660_v32 = vrot.slane %v4301_v36, %v971_v18 }
 0x5f3   : > { %v3709_v41 = vpop.eup %3708 }
 0x5f4   : > { %v1581_v42 = vmul.f32 %v3709_v41, %v4204_v61  ;;  %v4246_v46 = vadd.f32 %v3145_v44, %v1588_v43  ;;  %v3662_v61 = vld [vmem:[%s3981_s30 + $0x60] sm:$0xff]   ;;  %v1664_v41 = vrot.slane %v4301_v36, %v1663_v39 }
 0x5f6   : > { %v1589_v45 = vmul.f32 %v3144_v24, %v1581_v42  ;;  %v1656_v24 = vrot.slane %v4301_v36, %v4065_v37 }
 0x5f8   : > { %v4248_v47 = vadd.f32 %v3145_v44, %v1589_v45 }
 0x5fa   : > { %v1646_v49 = vpack.c.bf16 %v4248_v47, %v4246_v46 }
 0x5fc   : > { %1952 = vmatmul.mubr.bf16.vlgmr.msra.gmra.mrb[8].mxu1 %v1646_v49  ;;  %1995 = vmatmul.mubr.bf16.vlgmr.msra.gmra.mrb[12].mxu0 %v1646_v49 }
 0x5fd   : > { %2006 = vmatpush1.bf16.msra.mxu1 %v3622_v48  ;;  %2037 = vmatprep.mubr.bf16.mxu1 %v3778_v5  ;;  %v3658_v5 = vld [vmem:[%s3981_s30 + $0x58] sm:$0xff]  }
 0x5fe   : > { %2007 = vmatprep.subr.bf16.mxu1 %v3627_v50  ;;  %3305 = vmatpush3.bf16.msra.mxu0 %v3647_v51 }
 0x5ff   : > { %3306 = vmatprep.subr.bf16.mxu0 %v3650_v52 }
 0x601   : > { %2008 = vmatpush1.bf16.msra.mxu1 %v3625_v53 }
 0x602   : > { %2009 = vmatprep.subr.bf16.mxu1 %v3630_v54  ;;  %3307 = vmatpush3.bf16.msra.mxu0 %v3651_v55 }
 0x603   : > { %3308 = vmatprep.subr.bf16.mxu0 %v3654_v20 }
 0x605   : > { %2010 = vmatpush1.bf16.msra.mxu1 %v3628_v21 }
 0x606   : > { %2011 = vmatprep.subr.bf16.mxu1 %v3633_v56  ;;  %3309 = vmatpush3.bf16.msra.mxu0 %v3655_v57 }
 0x607   : > { %3310 = vmatprep.subr.bf16.mxu0 %v3658_v5 }
 0x609   : > { %2012 = vmatpush1.bf16.msra.mxu1 %v3631_v58 }
 0x60a   : > { %2013 = vmatprep.subr.bf16.mxu1 %v3636_v59  ;;  %3311 = vmatpush3.bf16.msra.mxu0 %v3659_v60 }
 0x60b   : > { %3312 = vmatprep.subr.bf16.mxu0 %v3662_v61 }
 0x60d   : > { %2014 = vmatpush1.bf16.msra.mxu1 %v3634_v62 }
 0x60e   : > { %2015 = vmatprep.subr.bf16.mxu1 %v3639_v63  ;;  %3313 = vmatpush3.bf16.msra.mxu0 %v3663_v0 }
 0x60f   : > { %3314 = vmatprep.subr.bf16.mxu0 %v3666_v1 }
 0x611   : > { %2016 = vmatpush1.bf16.msra.mxu1 %v3637_v2  ;;  %v3679_v2 = vld [vmem:[%s3981_s30 + $0x100] sm:$0xff]  }
 0x612   : > { %2017 = vmatprep.subr.bf16.mxu1 %v3642_v3  ;;  %3315 = vmatpush3.bf16.msra.mxu0 %v3667_v4  ;;  %v3680_v3 = vld [vmem:[%s3981_s30 + $0x148] sm:$0xff]  }
 0x613   : > { %3316 = vmatprep.subr.bf16.mxu0 %v3670_v25  ;;  %v3681_v4 = vld [vmem:[%s3981_s30 + $0x108] sm:$0xff]  }
 0x615   : > { %2018 = vmatpush1.bf16.msra.mxu1 %v3640_v6  ;;  %v3682_v6 = vld [vmem:[%s3981_s30 + $0x150] sm:$0xff]  }
 0x616   : > { %2019 = vmatprep.subr.bf16.mxu1 %v3645_v7  ;;  %3317 = vmatpush3.bf16.msra.mxu0 %v3671_v26  ;;  %v3683_v7 = vld [vmem:[%s3981_s30 + $0x110] sm:$0xff]  }
 0x617   : > { %3318 = vmatprep.subr.bf16.mxu0 %v3674_v29 }
 0x619   : > { %2020 = vmatpush1.bf16.msra.mxu1 %v3643_v8  ;;  %v3684_v8 = vld [vmem:[%s3981_s30 + $0x158] sm:$0xff]  }
 0x61a   : > { %3326 = vmatprep.subr.bf16.mxu1 %v3648_v9  ;;  %3319 = vmatpush3.bf16.msra.mxu0 %v3675_v30  ;;  %v3685_v9 = vld [vmem:[%s3981_s30 + $0x118] sm:$0xff]  }
 0x61b   : > { %3348 = vmatprep.subr.bf16.mxu0 %v3678_v38 }
 0x61c   : > { %2038 = vmatmul.mubr.bf16.vlgmr.msra.gmra.mrb[12].mxu1 %v1646_v49 }
 0x61d   : > { %3327 = vmatpush3.bf16.msra.mxu1 %v3649_v10  ;;  %v3686_v10 = vld [vmem:[%s3981_s30 + $0x160] sm:$0xff]  }
 0x61e   : > { %3328 = vmatprep.subr.bf16.mxu1 %v3652_v11  ;;  %v3687_v11 = vld [vmem:[%s3981_s30 + $0x120] sm:$0xff]  }
 0x621   : > { %3329 = vmatpush3.bf16.msra.mxu1 %v3653_v12  ;;  %v3688_v12 = vld [vmem:[%s3981_s30 + $0x168] sm:$0xff]  }
 0x622   : > { %3330 = vmatprep.subr.bf16.mxu1 %v3656_v13  ;;  %v1667_v13 = vsub.s32 4, %v4056_v34 }
 0x625   : > { %3331 = vmatpush3.bf16.msra.mxu1 %v3657_v14  ;;  %v1671_v14 = vsub.s32 5, %v4056_v34 }
 0x626   : > { %3332 = vmatprep.subr.bf16.mxu1 %v3660_v15  ;;  %v3689_v15 = vld [vmem:[%s3981_s30 + $0x128] sm:$0xff]  }
 0x629   : > { %3333 = vmatpush3.bf16.msra.mxu1 %v3661_v16  ;;  %v1668_v16 = vrot.slane %v4301_v36, %v1667_v13 }
 0x62a   : > { %3334 = vmatprep.subr.bf16.mxu1 %v3664_v17  ;;  %v3690_v17 = vld [vmem:[%s3981_s30 + $0x170] sm:$0xff]  }
 0x62d   : > { %3335 = vmatpush3.bf16.msra.mxu1 %v3665_v19  ;;  %v1672_v19 = vrot.slane %v4301_v36, %v1671_v14  ;;  %v3243_v14 = vld [vmem:[%s875_s7] ss:$0 sm:$0xff] }
 0x62e   : > { %3336 = vmatprep.subr.bf16.mxu1 %v3668_v22 }
 0x631   : > { %3337 = vmatpush3.bf16.msra.mxu1 %v3669_v23  ;;  %v3691_v23 = vld [vmem:[%s3981_s30 + $0x130] sm:$0xff]  }
 0x632   : > { %3338 = vmatprep.subr.bf16.mxu1 %v3672_v27  ;;  %v3692_v27 = vld [vmem:[%s3981_s30 + $0x178] sm:$0xff]  }
 0x635   : > { %3339 = vmatpush3.bf16.msra.mxu1 %v3673_v28 }
 0x636   : > { %3340 = vmatprep.subr.bf16.mxu1 %v3676_v31 }
 0x639   : > { %3341 = vmatpush3.bf16.msra.mxu1 %v3677_v33  ;;  %v3693_v33 = vld [vmem:[%s3981_s30 + $0x138] sm:$0xff]   ;;  %s4523_s30 = sld [smem:[#allocation26_spill]] (!%p3245_p8) }
 0x6cf   : > { %v1953_v42 = vpop.f32.mrb[8].mxu1  ;;  %v1996_v43 = vpop.f32.mrb[12].mxu0 }
 0x6d0   : > { %v1954_v44 = vadd.f32 %v1953_v42, %v1652_v40  ;;  %v1997_v45 = vadd.f32 %v1996_v43, %v1660_v32  ;;  %v1955_v48 = vpop.f32.mrb[9].mxu1  ;;  %v1998_v49 = vpop.f32.mrb[13].mxu0  ;;  %v3194_v43 = vld [vmem:[%s4515_s18] ss:$0 sm:$0xff] }
 0x6d1   : > { %v1956_v50 = vadd.f32 %v1955_v48, %v1656_v24  ;;  %v1999_v51 = vadd.f32 %v1998_v49, %v1664_v41  ;;  %v1957_v52 = vpop.f32.mrb[10].mxu1  ;;  %v2000_v53 = vpop.f32.mrb[14].mxu0 }
 0x6d2   : > { %v1958_v35 = vadd.f32 %v1957_v52, %v1652_v40  ;;  %v2001_v54 = vadd.f32 %v2000_v53, %v1660_v32  ;;  %v1959_v55 = vpop.f32.mrb[11].mxu1  ;;  %v2002_v18 = vpop.f32.mrb[15].mxu0  ;;  %v2048_v21 = vmax.f32 %v1954_v44, 0.0  ;;  %v2050_v56 = vmax.f32 %v1997_v45, 0.0 }
 0x6d3   : > { %v1960_v20 = vadd.f32 %v1959_v55, %v1656_v24  ;;  %v2003_v37 = vadd.f32 %v2002_v18, %v1664_v41  ;;  %v2049_v58 = vmax.f32 %v1956_v50, 0.0  ;;  %v2051_v59 = vmax.f32 %v1999_v51, 0.0 }
 0x6d4   : > { %v2054_v57 = vmax.f32 %v1958_v35, 0.0  ;;  %v2056_v5 = vmax.f32 %v2001_v54, 0.0 }
 0x6d5   : > { %v2055_v60 = vmax.f32 %v1960_v20, 0.0  ;;  %v2057_v61 = vmax.f32 %v2003_v37, 0.0 }
 0x6d6   : > { %v2156_v62 = vpack.c.bf16 %v2054_v57, %v2048_v21  ;;  %v2158_v63 = vpack.c.bf16 %v2056_v5, %v2050_v56 }
 0x6d7   : > { %v2157_v0 = vpack.c.bf16 %v2055_v60, %v2049_v58  ;;  %v2159_v1 = vpack.c.bf16 %v2057_v61, %v2051_v59 }
 0x6d9   : > { %2489 = vmatprep.mubr.bf16.mxu0 %v2157_v0  ;;  %2530 = vmatprep.mubr.bf16.mxu1 %v2159_v1 }
 0x6da   : > { %2490 = vmatmul.mubr.bf16.vlgmr.msra.gmra.mrb[16].mxu0 %v2156_v62  ;;  %2531 = vmatmul.mubr.bf16.vlgmr.msra.gmra.mrb[16].mxu1 %v2158_v63 }
 0x6db   : > { %3349 = vmatpush3.bf16.msra.mxu0 %v3679_v2 }
 0x6dc   : > { %3350 = vmatprep.subr.bf16.mxu0 %v3680_v3 }
 0x6df   : > { %3351 = vmatpush3.bf16.msra.mxu0 %v3681_v4 }
 0x6e0   : > { %3352 = vmatprep.subr.bf16.mxu0 %v3682_v6 }
 0x6e3   : > { %3353 = vmatpush3.bf16.msra.mxu0 %v3683_v7 }
 0x6e4   : > { %3354 = vmatprep.subr.bf16.mxu0 %v3684_v8 }
 0x6e7   : > { %3355 = vmatpush3.bf16.msra.mxu0 %v3685_v9 }
 0x6e8   : > { %3356 = vmatprep.subr.bf16.mxu0 %v3686_v10 }
 0x6eb   : > { %3357 = vmatpush3.bf16.msra.mxu0 %v3687_v11 }
 0x6ec   : > { %3358 = vmatprep.subr.bf16.mxu0 %v3688_v12 }
 0x6ef   : > { %v2039_v22 = vpop.f32.mrb[12].mxu1  ;;  %3359 = vmatpush3.bf16.msra.mxu0 %v3689_v15 }
 0x6f0   : > { %v2040_v25 = vadd.f32 %v2039_v22, %v1668_v16  ;;  %v2041_v26 = vpop.f32.mrb[13].mxu1  ;;  %3360 = vmatprep.subr.bf16.mxu0 %v3690_v17  ;;  %v3244_v17 = vld [vmem:[%s878_s9] ss:$0 sm:$0xff] }
 0x6f1   : > { %v2042_v28 = vadd.f32 %v2041_v26, %v1672_v19  ;;  %v2043_v29 = vpop.f32.mrb[14].mxu1 }
 0x6f2   : > { %v2044_v30 = vadd.f32 %v2043_v29, %v1668_v16  ;;  %v2045_v34 = vpop.f32.mrb[15].mxu1  ;;  %v2052_v38 = vmax.f32 %v2040_v25, 0.0 }
 0x6f3   : > { %v2046_v31 = vadd.f32 %v2045_v34, %v1672_v19  ;;  %3361 = vmatpush3.bf16.msra.mxu0 %v3691_v23  ;;  %v2053_v40 = vmax.f32 %v2042_v28, 0.0  ;;  %v3781_v28 = vmov (!%p3245_p8), 0.0  }
 0x6f4   : > { %v2058_v39 = vmax.f32 %v2044_v30, 0.0  ;;  %3362 = vmatprep.subr.bf16.mxu0 %v3692_v27  ;;  %v3716_v27 = vld [vmem:[%s4519_s2] sm:$0xff] (!%p3245_p8)   ;;  %3448 = vmatprep.subr.bf16.mxu1 (!%p3245_p8), %v3781_v28 }
 0x6f5   : > { %v2059_v36 = vmax.f32 %v2046_v31, 0.0  ;;  %3464 = vmatprep.mubr.msk.bf16.mxu1 (!%p3245_p8), %vm3782_vm1, %v3781_v28 }
 0x6f6   : > { %v2160_v32 = vpack.c.bf16 %v2058_v39, %v2052_v38  ;;  %v3718_v38 = vld [vmem:[%s4519_s2 + $0x10] sm:$0xff] (!%p3245_p8)   ;;  %v3719_v39 = vld [vmem:[%s4519_s2 + $0x18] sm:$0xff] (!%p3245_p8)  }
 0x6f7   : > { %v2161_v24 = vpack.c.bf16 %v2059_v36, %v2053_v40  ;;  %3363 = vmatpush3.bf16.msra.mxu0 %v3693_v33  ;;  %v3717_v33 = vld [vmem:[%s4519_s2 + $0x8] sm:$0xff] (!%p3245_p8)   ;;  %v3720_v40 = vld [vmem:[%s4519_s2 + $0x20] sm:$0xff] (!%p3245_p8)  }
 0x6f8   : > { %3428 = vmatprep.subr.bf16.mxu0 (!%p3245_p8), %v3781_v28  ;;  %v3721_v36 = vld [vmem:[%s4519_s2 + $0x28] sm:$0xff] (!%p3245_p8)  }
 0x6f9   : > { %2571 = vmatprep.mubr.bf16.mxu0 %v2161_v24  ;;  %v3723_v24 = vld [vmem:[%s4519_s2 + $0x38] sm:$0xff] (!%p3245_p8)  }
 0x6fa   : > { %2572 = vmatmul.mubr.bf16.vlgmr.msra.gmra.mrb[20].mxu0 %v2160_v32  ;;  %v3722_v32 = vld [vmem:[%s4519_s2 + $0x30] sm:$0xff] (!%p3245_p8)  }
 0x6fb   : > { %3429 = vmatpush3.bf16.msra.mxu0 (!%p3245_p8), %v3716_v27  ;;  %3444 = vmatprep.mubr.msk.bf16.mxu0 (!%p3245_p8), %vm3782_vm1, %v3781_v28 }
 0x6fc   : > { %3430 = vmatprep.subr.bf16.mxu0 (!%p3245_p8), %v3781_v28 }
 0x6ff   : > { %3431 = vmatpush3.bf16.msra.mxu0 (!%p3245_p8), %v3717_v33 }
 0x700   : > { %3432 = vmatprep.subr.bf16.mxu0 (!%p3245_p8), %v3781_v28 }
 0x703   : > { %3433 = vmatpush3.bf16.msra.mxu0 (!%p3245_p8), %v3718_v38 }
 0x704   : > { %3434 = vmatprep.subr.bf16.mxu0 (!%p3245_p8), %v3781_v28 }
 0x707   : > { %3435 = vmatpush3.bf16.msra.mxu0 (!%p3245_p8), %v3719_v39 }
 0x708   : > { %3436 = vmatprep.subr.bf16.mxu0 (!%p3245_p8), %v3781_v28 }
 0x70b   : > { %3437 = vmatpush3.bf16.msra.mxu0 (!%p3245_p8), %v3720_v40 }
 0x70c   : > { %3438 = vmatprep.subr.bf16.mxu0 (!%p3245_p8), %v3781_v28 }
 0x70f   : > { %3439 = vmatpush3.bf16.msra.mxu0 (!%p3245_p8), %v3721_v36 }
 0x710   : > { %3440 = vmatprep.subr.bf16.mxu0 (!%p3245_p8), %v3781_v28 }
 0x713   : > { %3441 = vmatpush3.bf16.msra.mxu0 (!%p3245_p8), %v3722_v32 }
 0x714   : > { %3442 = vmatprep.subr.bf16.mxu0 (!%p3245_p8), %v3781_v28 }
 0x717   : > { %3443 = vmatpush3.bf16.msra.mxu0 (!%p3245_p8), %v3723_v24 }
 0x7ad   : > { %v3320_v41 = vpop.f32.mrb[16].mxu0  ;;  %v3342_v42 = vpop.f32.mrb[16].mxu1 }
 0x7ae   : > { %v3321_v44 = vpop.f32.mrb[17].mxu0  ;;  %v3343_v45 = vpop.f32.mrb[17].mxu1 }
 0x7af   : > { %v3322_v48 = vadd.f32 %v3321_v44, %v3320_v41  ;;  %v3344_v49 = vadd.f32 %v3343_v45, %v3342_v42  ;;  %v3323_v50 = vpop.f32.mrb[18].mxu0  ;;  %v3345_v51 = vpop.f32.mrb[18].mxu1  ;;  %v3724_v41 = vld [vmem:[%s4520_s25] sm:$0xff] (!%p3245_p8)   ;;  %v3725_v42 = vld [vmem:[%s4520_s25 + $0x8] sm:$0xff] (!%p3245_p8)   ;;  %v3727_v44 = vld [vmem:[%s4520_s25 + $0x18] sm:$0xff] (!%p3245_p8)  }
 0x7b0   : > { %v3324_v52 = vpop.f32.mrb[19].mxu0  ;;  %v3346_v53 = vpop.f32.mrb[19].mxu1  ;;  %3449 = vmatpush3.bf16.msra.mxu1 (!%p3245_p8), %v3724_v41  ;;  %v3728_v45 = vld [vmem:[%s4520_s25 + $0x20] sm:$0xff] (!%p3245_p8)  }
 0x7b1   : > { %v2492_v35 = vadd.f32 %v3322_v48, %v3194_v43  ;;  %v3325_v54 = vadd.f32 %v3324_v52, %v3323_v50  ;;  %v3347_v55 = vadd.f32 %v3346_v53, %v3345_v51  ;;  %3450 = vmatprep.subr.bf16.mxu1 (!%p3245_p8), %v3781_v28  ;;  %v3729_v48 = vld [vmem:[%s4520_s25 + $0x28] sm:$0xff] (!%p3245_p8)   ;;  %v3246_v53 = vld [vmem:[%s4521_s10] ss:$0 sm:$0xff] (!%p3245_p8) }
 0x7b3   : > { %v2533_v18 = vadd.f32 %v3344_v49, %v2492_v35  ;;  %v2495_v20 = vadd.f32 %v3325_v54, %v3194_v43  ;;  %v3726_v43 = vld [vmem:[%s4520_s25 + $0x10] sm:$0xff] (!%p3245_p8)   ;;  %v3247_v54 = vld [vmem:[%s4522_s0] ss:$0 sm:$0xff] (!%p3245_p8) }
 0x7b4   : > { %3451 = vmatpush3.bf16.msra.mxu1 (!%p3245_p8), %v3725_v42 }
 0x7b5   : > { %v2536_v37 = vadd.f32 %v3347_v55, %v2495_v20  ;;  %3452 = vmatprep.subr.bf16.mxu1 (!%p3245_p8), %v3781_v28 }
 0x7b8   : > { %3453 = vmatpush3.bf16.msra.mxu1 (!%p3245_p8), %v3726_v43 }
 0x7b9   : > { %3454 = vmatprep.subr.bf16.mxu1 (!%p3245_p8), %v3781_v28 }
 0x7bc   : > { %3455 = vmatpush3.bf16.msra.mxu1 (!%p3245_p8), %v3727_v44 }
 0x7bd   : > { %3456 = vmatprep.subr.bf16.mxu1 (!%p3245_p8), %v3781_v28 }
 0x7c0   : > { %3457 = vmatpush3.bf16.msra.mxu1 (!%p3245_p8), %v3728_v45 }
 0x7c1   : > { %3458 = vmatprep.subr.bf16.mxu1 (!%p3245_p8), %v3781_v28 }
 0x7c4   : > { %3459 = vmatpush3.bf16.msra.mxu1 (!%p3245_p8), %v3729_v48 }
 0x7c5   : > { %3460 = vmatprep.subr.bf16.mxu1 (!%p3245_p8), %v3781_v28 }
 0x7cd   : > { %v3364_v21 = vpop.f32.mrb[20].mxu0 }
 0x7ce   : > { %v3365_v56 = vpop.f32.mrb[21].mxu0 }
 0x7cf   : > { %v3366_v57 = vadd.f32 %v3365_v56, %v3364_v21  ;;  %v3367_v5 = vpop.f32.mrb[22].mxu0  ;;  %v3730_v56 = vld [vmem:[%s4520_s25 + $0x30] sm:$0xff] (!%p3245_p8)  }
 0x7d0   : > { %v3368_v58 = vpop.f32.mrb[23].mxu0  ;;  %3461 = vmatpush3.bf16.msra.mxu1 (!%p3245_p8), %v3730_v56 }
 0x7d1   : > { %v2574_v59 = vadd.f32 %v3366_v57, %v2533_v18  ;;  %v3369_v60 = vadd.f32 %v3368_v58, %v3367_v5  ;;  %3462 = vmatprep.subr.bf16.mxu1 (!%p3245_p8), %v3781_v28  ;;  %v3731_v57 = vld [vmem:[%s4520_s25 + $0x38] sm:$0xff] (!%p3245_p8)   ;;  %v2675_v5 = vld [vmem:[%s4523_s30] sm:$0x1] (!%p3245_p8) }
 0x7d3   : > { %v2577_v61 = vadd.f32 %v3369_v60, %v2536_v37  ;;  %v2580_v62 = vadd.f32 %v2574_v59, %v4246_v46 }
 0x7d4   : > { %3463 = vmatpush3.bf16.msra.mxu1 (!%p3245_p8), %v3731_v57 }
 0x7d5   : > { %2584 = vadd.xlane.f32.xlu0 %v2580_v62  ;;  %v2581_v63 = vadd.f32 %v2577_v61, %v4248_v47 }
 0x7d7   : > { %2586 = vadd.xlane.f32.xlu1 %v2581_v63 }
 0x862   : > { %v2585_v0 = vpop.xlane.xlu0 %2584 }
 0x863   : > { %v2588_v1 = vmul.f32 0.0078125, %v2585_v0 }
 0x864   : > { %v2587_v2 = vpop.xlane.xlu1 %2586 }
 0x865   : > { %v2590_v3 = vsub.f32 %v2580_v62, %v2588_v1  ;;  %v2589_v4 = vmul.f32 0.0078125, %v2587_v2  ;;  %v3783_v2 = vmov (!%p3245_p8), 0  }
 0x866   : > { %3714 = vset.pattern.permute.xlu1 (!%p3245_p8), %v3783_v2  ;;  %3715 = vset.pattern.permute.xlu0 (!%p3245_p8), %v3783_v2 }
 0x867   : > { %v2591_v6 = vsub.f32 %v2581_v63, %v2589_v4  ;;  %v2592_v7 = vmul.f32 %v2590_v3, %v2590_v3 }
 0x869   : > { %2594 = vadd.xlane.f32.xlu0 %v2592_v7  ;;  %v2593_v8 = vmul.f32 %v2591_v6, %v2591_v6 }
 0x86b   : > { %2596 = vadd.xlane.f32.xlu1 %v2593_v8 }
 0x8f6   : > { %v2595_v9 = vpop.xlane.xlu0 %2594 }
 0x8f7   : > { %v2598_v10 = vmul.f32 0.0078125, %v2595_v9 }
 0x8f8   : > { %v2597_v11 = vpop.xlane.xlu1 %2596 }
 0x8f9   : > { %v2600_v46 = vadd.f32 1e-05, %v2598_v10  ;;  %v2599_v12 = vmul.f32 0.0078125, %v2597_v11 }
 0x8fb   : > { %3710 = vrsqrt.f32 %v2600_v46  ;;  %v2601_v47 = vadd.f32 1e-05, %v2599_v12 }
 0x8fd   : > { %3712 = vrsqrt.f32 %v2601_v47 }
 0x905   : > { %v3711_v13 = vpop.eup %3710 }
 0x906   : > { %v2604_v15 = vmul.f32 %v3711_v13, %v2590_v3  ;;  %v2784_v3 = vld [vmem:[#allocation3] sm:$0x1] (!%p3245_p8) }
 0x907   : > { %v3713_v16 = vpop.eup %3712 }
 0x908   : > { %v2612_v19 = vmul.f32 %v3243_v14, %v2604_v15  ;;  %v2605_v22 = vmul.f32 %v3713_v16, %v2591_v6  ;;  %2627 = sbr.rel (%p3245_p8) target bundleno = 3222 (0xc96), region = 112 }
 0x90a   : > { %v2620_v23 = vadd.f32 %v3244_v17, %v2612_v19  ;;  %v2613_v25 = vmul.f32 %v3243_v14, %v2605_v22 }
 0x90c   : > { %2622 = vst [vmem:[#allocation2] sm:$0xff] %v2620_v23  ;;  %v2621_v26 = vadd.f32 %v3244_v17, %v2613_v25  ;;  %2630 = vadd.xlane.f32.xlu0 (!%p3245_p8), %v2620_v23 }
 0x90e   : > { %2623 = vst [vmem:[#allocation2 + $0x8] sm:$0xff] %v2621_v26 }
 0x999   : > { %v2631_v29 = vpop.xlane.xlu0 %2630 }
 0x99a   : > { %v2632_v30 = vmul.f32 0.0078125, %v2631_v29 }
 0x99c   : > { %v2633_v34 = vsub.f32 %v2620_v23, %v2632_v30 }
 0x99e   : > { %v2634_v31 = vmul.f32 %v2633_v34, %v2633_v34 }
 0x9a0   : > { %2635 = vadd.xlane.f32.xlu0 %v2634_v31 }
 0xa2d   : > { %v2636_v49 = vpop.xlane.xlu0 %2635 }
 0xa2e   : > { %v2637_v50 = vmul.f32 0.0078125, %v2636_v49 }
 0xa30   : > { %v2638_v51 = vadd.f32 1e-05, %v2637_v50 }
 0xa32   : > { %3732 = vrsqrt.f32 %v2638_v51 }
 0xa3c   : > { %v3733_v52 = vpop.eup %3732 }
 0xa3d   : > { %v2640_v35 = vmul.f32 %v3733_v52, %v2633_v34 }
 0xa3f   : > { %v2647_v55 = vmul.f32 %v3246_v53, %v2640_v35 }
 0xa41   : > { %v2654_v18 = vadd.f32 %v3247_v54, %v2647_v55 }
 0xa43   : > { %vm2655_vm2 = vcmp.gt.f32.partialorder %v2654_v18, 0.0  ;;  %v2656_v20 = vmul.f32 0.01, %v2654_v18 }
 0xa45   : > { %v2657_v37 = vsel %vm2655_vm2, %v2654_v18, %v2656_v20 }
 0xa46   : > { %v2674_v21 = vpack.c.bf16 %v2657_v37, %v2657_v37 }
 0xa48   : > { %3445 = vmatmul.mubr.bf16.vlgmr.msra.gmra.mrb[0].mxu0 %v2674_v21 }
 0xb1b   : > { %v2758_v58 = vpop.f32.mrb[0].mxu0 }
 0xb1c   : > { %v2759_v59 = vadd.f32 %v2758_v58, %v2675_v5  ;;  %v3446_v60 = vpop.f32.mrb[1].mxu0 }
 0xb1d   : > { %v2761_v61 = vpop.f32.mrb[2].mxu0 }
 0xb1e   : > { %vm2764_vm3 = vcmp.gt.f32.partialorder %v2759_v59, 0.0  ;;  %v2765_v62 = vmul.f32 0.01, %v2759_v59  ;;  %v3447_v63 = vpop.f32.mrb[3].mxu0 }
 0xb20   : > { %v2766_v0 = vsel %vm2764_vm3, %v2759_v59, %v2765_v62 }
 0xb21   : > { %v2783_v1 = vpack.c.bf16 %v2766_v0, %v2766_v0 }
 0xb23   : > { %3465 = vmatmul.mubr.bf16.vlgmr.msra.gmra.mrb[0].mxu1 %v2783_v1 }
 0xbf6   : > { %v2867_v4 = vpop.f32.mrb[0].mxu1 }
 0xbf7   : > { %v2868_v6 = vadd.f32 %v2867_v4, %v2784_v3  ;;  %v3466_v7 = vpop.f32.mrb[1].mxu1 }
 0xbf8   : > { %v2870_v8 = vpop.f32.mrb[2].mxu1 }
 0xbf9   : > { %v2873_v9 = vsub.f32 0.0, %v2868_v6  ;;  %v3467_v10 = vpop.f32.mrb[3].mxu1 }
 0xbfb   : > { %v2874_v11 = vmul.f32 1.442695, %v2873_v9 }
 0xbfd   : > { %3734 = vpow2.f32 %v2874_v11 }
 0xc07   : > { %v3735_v46 = vpop.eup %3734 }
 0xc08   : > { %v2876_v12 = vadd.f32 1.0, %v3735_v46 }
 0xc0a   : > { %3736 = vrcp.f32 %v2876_v12 }
 0xc14   : > { %v3737_v47 = vpop.eup %3736 }
 0xc15   : > { %2881 = vperm.xlu1 %3714, %v3737_v47  }
 0xc94   : > { %v2882_v13 = vpop.permute.xlu1 %2881 }
 0xc95   : > { %2884 = vst [vmem:[%s881_s17] sm:$0x1] %v2882_v13 }
 0xc96 PF: > { %s4525_s22 = sld [smem:[#allocation7_spill]]  ;;  %s4526_s26 = sld [smem:[#allocation5_spill]] }
 0xc97   : > { %s4527_s27 = sld [smem:[#allocation6_spill]]  ;;  %s4528_s3 = sld [smem:[#allocation8_spill]] }
 0xc98   : > { %s4529_s28 = sld [smem:[#allocation9_spill]] }
 0xc9c   : > { %s33_s29 = sadd.s32 1, %s4525_s22  }
 0xc9d   : > { %p30_p9 = scmp.ge.s32.totalorder %s33_s29, 14  }
 0xc9f   :  { %32 = sbr.rel (!%p30_p9) target bundleno = 19 (0x13), region = 181 }

</bundles_post_ra>
